<compile_context>
chip_gen: v7x
topology: tpu7x:2x2x1
jax: 0.10.0
libtpu: 0.0.40
codegen_flags: <defaults>
</compile_context>

<pallas_src>
import functools
import math

import jax
import jax.numpy as jnp
from jax import lax
from jax.experimental import pallas as pl
from jax.experimental.pallas import tpu as pltpu


def _decoder_layer_kernel(
    hs_ref,
    cosq_ref, sinloq_ref, sinhiq_ref,
    cosk_ref, sinlok_ref, sinhik_ref,
    ln1_ref, wq_ref, wk_ref, wv_ref, wo_ref,
    ln2_ref, wg_ref, wu_ref, wd_ref,
    out_ref,
    attn_slab,
    *, num_heads, num_kv_heads, head_dim, eps,
):
    S = hs_ref.shape[1]
    n_rep = num_heads // num_kv_heads
    q_width = num_heads * head_dim
    kv_width = num_kv_heads * head_dim
    half = head_dim // 2
    scale = 1.0 / math.sqrt(head_dim)

    x_in = hs_ref[0]                                   # [S, H]  (model dtype, e.g. bf16)
    cdtype = x_in.dtype
    x = x_in.astype(jnp.float32)

    # ---------------- input RMSNorm (f32 stats, mirrors MllamaTextRMSNorm) ----------------
    var = jnp.mean(x * x, axis=-1, keepdims=True)
    xn = ln1_ref[...] * (x * lax.rsqrt(var + eps)).astype(cdtype)        # [S, H]  bf16

    # ---------------- q / k / v projections: bf16 operands, f32 accumulation ----------------
    q = jnp.dot(xn, wq_ref[...], preferred_element_type=jnp.float32)     # [S, nH*Dh]
    k = jnp.dot(xn, wk_ref[...], preferred_element_type=jnp.float32)     # [S, nKV*Dh]
    v = jnp.dot(xn, wv_ref[...], preferred_element_type=jnp.float32)     # [S, nKV*Dh]

    # ---------------- RoPE on the full Q / K matrices ----------------
    # rotate_half(t) per head == select(roll(t, -Dh/2), roll(t, +Dh/2)); the +/-1 sign and the
    # first/second-half select are folded into the precomputed sin_lo / sin_hi tables.
    def rope(t, width, cos_r, sinlo_r, sinhi_r):
        return (t * cos_r[...]
                + pltpu.roll(t, width - half, axis=1) * sinlo_r[...]
                + pltpu.roll(t, half, axis=1) * sinhi_r[...])

    q = rope(q, q_width, cosq_ref, sinloq_ref, sinhiq_ref)
    k = rope(k, kv_width, cosk_ref, sinlok_ref, sinhik_ref)

    q_b = (q * scale).astype(cdtype)     # fold 1/sqrt(Dh) into Q before the score matmul
    k_b = k.astype(cdtype)
    v_b = v.astype(cdtype)

    # ---------------- causal mask generated in-kernel (no O(S^2) HBM stream) ----------------
    row = lax.broadcasted_iota(jnp.int32, (S, S), 0)
    col = lax.broadcasted_iota(jnp.int32, (S, S), 1)
    causal = col <= row
    neg = jnp.float32(-1e30)

    # ---------------- attention, unrolled over kv-heads / their query group ----------------
    for g in range(num_kv_heads):
        kg = k_b[:, g * head_dim:(g + 1) * head_dim]                      # [S, Dh]
        vg = v_b[:, g * head_dim:(g + 1) * head_dim]
        for r in range(n_rep):
            h = g * n_rep + r
            qh = q_b[:, h * head_dim:(h + 1) * head_dim]                  # [S, Dh]
            s = jnp.einsum("qd,kd->qk", qh, kg,
                           preferred_element_type=jnp.float32)            # [S, S] f32
            s = jnp.where(causal, s, neg)
            m = jnp.max(s, axis=-1, keepdims=True)
            p = jnp.exp(s - m)                                            # f32 softmax numerator
            l = jnp.sum(p, axis=-1, keepdims=True)                        # [S, 1] f32
            oh = jnp.dot(p.astype(cdtype), vg,
                         preferred_element_type=jnp.float32)              # [S, Dh] f32
            oh = oh * pl.reciprocal(l, approx=True)                       # normalize after PV
            attn_slab[:, h * head_dim:(h + 1) * head_dim] = oh.astype(cdtype)

    # one full-contraction o_proj matmul over the [S, nH*Dh] slab
    attn_out = jnp.dot(attn_slab[...], wo_ref[...],
                       preferred_element_type=jnp.float32)                # [S, H] f32
    h1 = x + attn_out                                                     # first residual (f32)

    # ---------------- post-attention RMSNorm + SwiGLU MLP ----------------
    var2 = jnp.mean(h1 * h1, axis=-1, keepdims=True)
    h1n = ln2_ref[...] * (h1 * lax.rsqrt(var2 + eps)).astype(cdtype)      # [S, H] bf16

    g_p = jnp.dot(h1n, wg_ref[...], preferred_element_type=jnp.float32)   # [S, I]
    u_p = jnp.dot(h1n, wu_ref[...], preferred_element_type=jnp.float32)   # [S, I]
    act = (jax.nn.silu(g_p) * u_p).astype(cdtype)
    mlp = jnp.dot(act, wd_ref[...], preferred_element_type=jnp.float32)   # [S, H]

    out_ref[0] = (h1 + mlp).astype(out_ref.dtype)


def mllama_self_attention_decoder_layer(
    hidden_states, cos, sin,
    ln1_w, wq_t, wk_t, wv_t, wo_t, ln2_w, wg_t, wu_t, wd_t,
    *, num_heads, num_kv_heads, eps=1e-5, alias_output=False,
):
    """hidden_states: [B, S, H] (model dtype, e.g. bf16)
       cos, sin: [S, head_dim] rotary tables (HF layout, halves duplicated; shared across batch)
       ln*_w: [H] RMSNorm weights
       wq_t/wk_t/wv_t: [H, nH*Dh] / [H, nKV*Dh] / [H, nKV*Dh] (transposed: y = x @ W^T)
       wo_t: [nH*Dh, H];  wg_t/wu_t: [H, I];  wd_t: [I, H]"""
    B, S, H = hidden_states.shape
    head_dim = H // num_heads
    half = head_dim // 2
    q_width = num_heads * head_dim
    kv_width = num_kv_heads * head_dim
    inter = wg_t.shape[1]
    dtype = hidden_states.dtype

    # RoPE tables tiled to full q/k width with the rotate_half sign + half-select folded in.
    # f32 for accuracy; small at demo size.
    # TODO(synk): at production S pass [S, Dh] tables and tile once in-kernel instead.
    cos32 = cos.astype(jnp.float32)
    sin32 = sin.astype(jnp.float32)
    lo = (jnp.arange(head_dim) < half)[None, :]
    sin_lo = jnp.where(lo, -sin32, 0.0)
    sin_hi = jnp.where(lo, 0.0, sin32)
    cos_q, sin_lo_q, sin_hi_q = [jnp.tile(t, (1, num_heads)) for t in (cos32, sin_lo, sin_hi)]
    cos_k, sin_lo_k, sin_hi_k = [jnp.tile(t, (1, num_kv_heads)) for t in (cos32, sin_lo, sin_hi)]

    ln1 = ln1_w.reshape(1, H).astype(dtype)
    ln2 = ln2_w.reshape(1, H).astype(dtype)
    # Feed the MXU model-dtype (bf16) weight operands.
    wq_t, wk_t, wv_t, wo_t, wg_t, wu_t, wd_t = [
        w.astype(dtype) for w in (wq_t, wk_t, wv_t, wo_t, wg_t, wu_t, wd_t)]

    kernel = functools.partial(
        _decoder_layer_kernel, num_heads=num_heads, num_kv_heads=num_kv_heads,
        head_dim=head_dim, eps=eps)

    per_batch = lambda b: (b, 0, 0)
    const2 = lambda b: (0, 0)

    in_specs = [
        pl.BlockSpec((1, S, H), per_batch),        # hidden_states
        pl.BlockSpec((S, q_width), const2),        # cos   (q, tiled)
        pl.BlockSpec((S, q_width), const2),        # sin_lo(q)
        pl.BlockSpec((S, q_width), const2),        # sin_hi(q)
        pl.BlockSpec((S, kv_width), const2),       # cos   (k, tiled)
        pl.BlockSpec((S, kv_width), const2),       # sin_lo(k)
        pl.BlockSpec((S, kv_width), const2),       # sin_hi(k)
        pl.BlockSpec((1, H), const2),              # input_layernorm weight
        pl.BlockSpec((H, q_width), const2),        # Wq^T
        pl.BlockSpec((H, kv_width), const2),       # Wk^T
        pl.BlockSpec((H, kv_width), const2),       # Wv^T
        pl.BlockSpec((q_width, H), const2),        # Wo^T
        pl.BlockSpec((1, H), const2),              # post_attention_layernorm weight
        pl.BlockSpec((H, inter), const2),          # gate_proj^T
        pl.BlockSpec((H, inter), const2),          # up_proj^T
        pl.BlockSpec((inter, H), const2),          # down_proj^T
    ]

    # TODO(synk): on v7x add a "parallel" sequence-tile grid axis (flash-style) so both
    #             TensorCores get work even at B=1, and single-buffer the weight specs.
    return pl.pallas_call(
        kernel,
        grid=(B,),
        in_specs=in_specs,
        out_specs=pl.BlockSpec((1, S, H), per_batch),
        out_shape=jax.ShapeDtypeStruct((B, S, H), dtype),
        scratch_shapes=[pltpu.VMEM((S, q_width), dtype)],   # per-head attn-output slab
        compiler_params=pltpu.CompilerParams(dimension_semantics=("parallel",)),
        input_output_aliases={0: 0} if alias_output else {},
    )(hidden_states, cos_q, sin_lo_q, sin_hi_q, cos_k, sin_lo_k, sin_hi_k,
      ln1, wq_t, wk_t, wv_t, wo_t, ln2, wg_t, wu_t, wd_t)


if __name__ == "__main__":
    # Small config consistent with the module (lane-dense hidden size). bf16 model dtype.
    B, S, H = 2, 16, 128
    num_heads, num_kv_heads = 4, 2
    head_dim = H // num_heads           # 32
    inter = 256
    eps = 1e-5
    rope_theta = 10000.0
    dtype = jnp.bfloat16

    key = jax.random.PRNGKey(0)
    keys = jax.random.split(key, 10)
    hidden_states = jax.random.normal(keys[0], (B, S, H), jnp.float32).astype(dtype)

    def mk_w(k, shape, fan_in):
        return (jax.random.normal(k, shape, jnp.float32) * (fan_in ** -0.5)).astype(dtype)

    wq_t = mk_w(keys[1], (H, num_heads * head_dim), H)
    wk_t = mk_w(keys[2], (H, num_kv_heads * head_dim), H)
    wv_t = mk_w(keys[3], (H, num_kv_heads * head_dim), H)
    wo_t = mk_w(keys[4], (num_heads * head_dim, H), num_heads * head_dim)
    wg_t = mk_w(keys[5], (H, inter), H)
    wu_t = mk_w(keys[6], (H, inter), H)
    wd_t = mk_w(keys[7], (inter, H), inter)
    ln1_w = (1.0 + 0.1 * jax.random.normal(keys[8], (H,), jnp.float32)).astype(dtype)
    ln2_w = (1.0 + 0.1 * jax.random.normal(keys[9], (H,), jnp.float32)).astype(dtype)

    # RoPE tables (HF layout [S, Dh], halves duplicated), shared across batch.
    pos = jnp.arange(S, dtype=jnp.float32)
    inv_freq = 1.0 / (rope_theta ** (jnp.arange(0, head_dim, 2, dtype=jnp.float32) / head_dim))
    freqs = pos[:, None] * inv_freq[None, :]
    emb = jnp.concatenate([freqs, freqs], axis=-1)          # [S, Dh]
    cos = jnp.cos(emb)
    sin = jnp.sin(emb)

    out = mllama_self_attention_decoder_layer(
        hidden_states, cos, sin,
        ln1_w, wq_t, wk_t, wv_t, wo_t, ln2_w, wg_t, wu_t, wd_t,
        num_heads=num_heads, num_kv_heads=num_kv_heads, eps=eps)
    out = jax.block_until_ready(out)

    # ---------------- pure-JAX f32 reference (mirrors the PyTorch forward, causal mask) ------
    f32 = jnp.float32
    hp = "highest"
    hs = hidden_states.astype(f32)

    def rmsnorm(h, wgt):
        var = jnp.mean(h * h, axis=-1, keepdims=True)
        return wgt * (h * lax.rsqrt(var + eps))

    def rotate_half(t):
        return jnp.concatenate([-t[..., head_dim // 2:], t[..., :head_dim // 2]], axis=-1)

    xn = rmsnorm(hs, ln1_w.astype(f32))
    q = jnp.dot(xn, wq_t.astype(f32), precision=hp).reshape(B, S, num_heads, head_dim).transpose(0, 2, 1, 3)
    k = jnp.dot(xn, wk_t.astype(f32), precision=hp).reshape(B, S, num_kv_heads, head_dim).transpose(0, 2, 1, 3)
    v = jnp.dot(xn, wv_t.astype(f32), precision=hp).reshape(B, S, num_kv_heads, head_dim).transpose(0, 2, 1, 3)
    cos_b, sin_b = cos[None, None], sin[None, None]
    q = q * cos_b + rotate_half(q) * sin_b
    k = k * cos_b + rotate_half(k) * sin_b
    n_rep = num_heads // num_kv_heads
    k = jnp.repeat(k, n_rep, axis=1)
    v = jnp.repeat(v, n_rep, axis=1)
    scores = jnp.einsum("bhqd,bhkd->bhqk", q, k, precision=hp) / math.sqrt(head_dim)
    rowi = jnp.arange(S)[:, None]
    coli = jnp.arange(S)[None, :]
    scores = jnp.where(coli <= rowi, scores, -1e30)
    probs = jax.nn.softmax(scores, axis=-1)
    attn = jnp.einsum("bhqk,bhkd->bhqd", probs, v, precision=hp)
    attn = attn.transpose(0, 2, 1, 3).reshape(B, S, num_heads * head_dim)
    attn = jnp.dot(attn, wo_t.astype(f32), precision=hp)
    h1 = hs + attn
    h1n = rmsnorm(h1, ln2_w.astype(f32))
    mlp = jnp.dot(jax.nn.silu(jnp.dot(h1n, wg_t.astype(f32), precision=hp))
                  * jnp.dot(h1n, wu_t.astype(f32), precision=hp),
                  wd_t.astype(f32), precision=hp)
    ref = h1 + mlp

    assert out.shape == hidden_states.shape
    assert out.dtype == hidden_states.dtype
    err = float(jnp.max(jnp.abs(out.astype(f32) - ref)))
    # bf16 MXU operands vs f32 reference -> loosened tolerance (documented in the perf review).
    assert jnp.allclose(out.astype(f32), ref, atol=1.5e-1, rtol=1e-1), err
    print("KERNEL_OK")
</pallas_src>

<mosaic_0001>
module attributes {stable_mosaic.version = 11 : i64} {
  func.func @_decoder_layer_kernel(%arg0: i32, %arg1: memref<1x16x128xbf16, #tpu.memory_space<vmem>>, %arg2: memref<16x128xf32, #tpu.memory_space<vmem>>, %arg3: memref<16x128xf32, #tpu.memory_space<vmem>>, %arg4: memref<16x128xf32, #tpu.memory_space<vmem>>, %arg5: memref<16x64xf32, #tpu.memory_space<vmem>>, %arg6: memref<16x64xf32, #tpu.memory_space<vmem>>, %arg7: memref<16x64xf32, #tpu.memory_space<vmem>>, %arg8: memref<1x128xbf16, #tpu.memory_space<vmem>>, %arg9: memref<128x128xbf16, #tpu.memory_space<vmem>>, %arg10: memref<128x64xbf16, #tpu.memory_space<vmem>>, %arg11: memref<128x64xbf16, #tpu.memory_space<vmem>>, %arg12: memref<128x128xbf16, #tpu.memory_space<vmem>>, %arg13: memref<1x128xbf16, #tpu.memory_space<vmem>>, %arg14: memref<128x256xbf16, #tpu.memory_space<vmem>>, %arg15: memref<128x256xbf16, #tpu.memory_space<vmem>>, %arg16: memref<256x128xbf16, #tpu.memory_space<vmem>>, %arg17: memref<1x16x128xbf16, #tpu.memory_space<vmem>>, %arg18: memref<16x128xbf16, #tpu.memory_space<vmem>>) attributes {dimension_semantics = [#tpu.dimension_semantics<parallel>], iteration_bounds = array<i64: 2>, scalar_prefetch = 0 : i64, scratch_operands = 1 : i64, tpu.core_type = #tpu.core_type<tc>, window_params = [{transform_indices = @transform_0, window_bounds = array<i64: 1, 16, 128>}, {pipeline_mode = #tpu.pipeline_mode<synchronous>, transform_indices = @transform_1, window_bounds = array<i64: 16, 128>}, {pipeline_mode = #tpu.pipeline_mode<synchronous>, transform_indices = @transform_2, window_bounds = array<i64: 16, 128>}, {pipeline_mode = #tpu.pipeline_mode<synchronous>, transform_indices = @transform_3, window_bounds = array<i64: 16, 128>}, {pipeline_mode = #tpu.pipeline_mode<synchronous>, transform_indices = @transform_4, window_bounds = array<i64: 16, 64>}, {pipeline_mode = #tpu.pipeline_mode<synchronous>, transform_indices = @transform_5, window_bounds = array<i64: 16, 64>}, {pipeline_mode = #tpu.pipeline_mode<synchronous>, transform_indices = @transform_6, window_bounds = array<i64: 16, 64>}, {pipeline_mode = #tpu.pipeline_mode<synchronous>, transform_indices = @transform_7, window_bounds = array<i64: 1, 128>}, {pipeline_mode = #tpu.pipeline_mode<synchronous>, transform_indices = @transform_8, window_bounds = array<i64: 128, 128>}, {pipeline_mode = #tpu.pipeline_mode<synchronous>, transform_indices = @transform_9, window_bounds = array<i64: 128, 64>}, {pipeline_mode = #tpu.pipeline_mode<synchronous>, transform_indices = @transform_10, window_bounds = array<i64: 128, 64>}, {pipeline_mode = #tpu.pipeline_mode<synchronous>, transform_indices = @transform_11, window_bounds = array<i64: 128, 128>}, {pipeline_mode = #tpu.pipeline_mode<synchronous>, transform_indices = @transform_12, window_bounds = array<i64: 1, 128>}, {pipeline_mode = #tpu.pipeline_mode<synchronous>, transform_indices = @transform_13, window_bounds = array<i64: 128, 256>}, {pipeline_mode = #tpu.pipeline_mode<synchronous>, transform_indices = @transform_14, window_bounds = array<i64: 128, 256>}, {pipeline_mode = #tpu.pipeline_mode<synchronous>, transform_indices = @transform_15, window_bounds = array<i64: 256, 128>}, {transform_indices = @transform_16, window_bounds = array<i64: 1, 16, 128>}]} {
    %c0 = arith.constant 0 : index
    %c0_0 = arith.constant 0 : index
    %c0_1 = arith.constant 0 : index
    %0 = vector.load %arg1[%c0, %c0_0, %c0_1] : memref<1x16x128xbf16, #tpu.memory_space<vmem>>, vector<1x16x128xbf16>
    %1 = vector.shape_cast %0 : vector<1x16x128xbf16> to vector<16x128xbf16>
    %2 = arith.extf %1 : vector<16x128xbf16> to vector<16x128xf32>
    %3 = arith.mulf %2, %2 : vector<16x128xf32>
    %cst = arith.constant dense<0.000000e+00> : vector<16xf32>
    %4 = vector.multi_reduction <add>, %3, %cst [1] : vector<16x128xf32> to vector<16xf32>
    %5 = vector.shape_cast %4 : vector<16xf32> to vector<16x1xf32>
    %cst_2 = arith.constant 1.280000e+02 : f32
    %6 = vector.broadcast %cst_2 : f32 to vector<16x1xf32>
    %7 = arith.divf %5, %6 : vector<16x1xf32>
    %c0_3 = arith.constant 0 : index
    %c0_4 = arith.constant 0 : index
    %8 = vector.load %arg8[%c0_3, %c0_4] : memref<1x128xbf16, #tpu.memory_space<vmem>>, vector<1x128xbf16>
    %cst_5 = arith.constant 9.99999974E-6 : f32
    %9 = vector.broadcast %cst_5 : f32 to vector<16x1xf32>
    %10 = arith.addf %7, %9 : vector<16x1xf32>
    %11 = math.rsqrt %10 : vector<16x1xf32>
    %12 = vector.broadcast %11 : vector<16x1xf32> to vector<16x128xf32>
    %13 = arith.mulf %2, %12 : vector<16x128xf32>
    %14 = arith.truncf %13 : vector<16x128xf32> to vector<16x128xbf16>
    %15 = vector.broadcast %8 : vector<1x128xbf16> to vector<16x128xbf16>
    %16 = arith.mulf %15, %14 : vector<16x128xbf16>
    %c0_6 = arith.constant 0 : index
    %c0_7 = arith.constant 0 : index
    %17 = vector.load %arg9[%c0_6, %c0_7] : memref<128x128xbf16, #tpu.memory_space<vmem>>, vector<128x128xbf16>
    %cst_8 = arith.constant dense<0.000000e+00> : vector<16x128xf32>
    %18 = tpu.matmul %16, %17, %cst_8 {dimension_numbers = #tpu.dot_dimension_numbers<[1], [0], [0], [1], [0, 0, 1, 1], [], []>} : vector<16x128xbf16>, vector<128x128xbf16>, vector<16x128xf32> -> vector<16x128xf32>
    %c0_9 = arith.constant 0 : index
    %c0_10 = arith.constant 0 : index
    %19 = vector.load %arg10[%c0_9, %c0_10] : memref<128x64xbf16, #tpu.memory_space<vmem>>, vector<128x64xbf16>
    %cst_11 = arith.constant dense<0.000000e+00> : vector<16x64xf32>
    %20 = tpu.matmul %16, %19, %cst_11 {dimension_numbers = #tpu.dot_dimension_numbers<[1], [0], [0], [1], [0, 0, 1, 1], [], []>} : vector<16x128xbf16>, vector<128x64xbf16>, vector<16x64xf32> -> vector<16x64xf32>
    %c0_12 = arith.constant 0 : index
    %c0_13 = arith.constant 0 : index
    %21 = vector.load %arg11[%c0_12, %c0_13] : memref<128x64xbf16, #tpu.memory_space<vmem>>, vector<128x64xbf16>
    %cst_14 = arith.constant dense<0.000000e+00> : vector<16x64xf32>
    %22 = tpu.matmul %16, %21, %cst_14 {dimension_numbers = #tpu.dot_dimension_numbers<[1], [0], [0], [1], [0, 0, 1, 1], [], []>} : vector<16x128xbf16>, vector<128x64xbf16>, vector<16x64xf32> -> vector<16x64xf32>
    %c0_15 = arith.constant 0 : index
    %c0_16 = arith.constant 0 : index
    %23 = vector.load %arg2[%c0_15, %c0_16] : memref<16x128xf32, #tpu.memory_space<vmem>>, vector<16x128xf32>
    %24 = arith.mulf %18, %23 : vector<16x128xf32>
    %c112_i32 = arith.constant 112 : i32
    %25 = tpu.dynamic_rotate %18 by %c112_i32 dim 1 : vector<16x128xf32>, i32 -> vector<16x128xf32>
    %c0_17 = arith.constant 0 : index
    %c0_18 = arith.constant 0 : index
    %26 = vector.load %arg3[%c0_17, %c0_18] : memref<16x128xf32, #tpu.memory_space<vmem>>, vector<16x128xf32>
    %27 = arith.mulf %25, %26 : vector<16x128xf32>
    %28 = arith.addf %24, %27 : vector<16x128xf32>
    %c16_i32 = arith.constant 16 : i32
    %29 = tpu.dynamic_rotate %18 by %c16_i32 dim 1 : vector<16x128xf32>, i32 -> vector<16x128xf32>
    %c0_19 = arith.constant 0 : index
    %c0_20 = arith.constant 0 : index
    %30 = vector.load %arg4[%c0_19, %c0_20] : memref<16x128xf32, #tpu.memory_space<vmem>>, vector<16x128xf32>
    %31 = arith.mulf %29, %30 : vector<16x128xf32>
    %32 = arith.addf %28, %31 : vector<16x128xf32>
    %c0_21 = arith.constant 0 : index
    %c0_22 = arith.constant 0 : index
    %33 = vector.load %arg5[%c0_21, %c0_22] : memref<16x64xf32, #tpu.memory_space<vmem>>, vector<16x64xf32>
    %34 = arith.mulf %20, %33 : vector<16x64xf32>
    %c48_i32 = arith.constant 48 : i32
    %35 = tpu.dynamic_rotate %20 by %c48_i32 dim 1 : vector<16x64xf32>, i32 -> vector<16x64xf32>
    %c0_23 = arith.constant 0 : index
    %c0_24 = arith.constant 0 : index
    %36 = vector.load %arg6[%c0_23, %c0_24] : memref<16x64xf32, #tpu.memory_space<vmem>>, vector<16x64xf32>
    %37 = arith.mulf %35, %36 : vector<16x64xf32>
    %38 = arith.addf %34, %37 : vector<16x64xf32>
    %c16_i32_25 = arith.constant 16 : i32
    %39 = tpu.dynamic_rotate %20 by %c16_i32_25 dim 1 : vector<16x64xf32>, i32 -> vector<16x64xf32>
    %c0_26 = arith.constant 0 : index
    %c0_27 = arith.constant 0 : index
    %40 = vector.load %arg7[%c0_26, %c0_27] : memref<16x64xf32, #tpu.memory_space<vmem>>, vector<16x64xf32>
    %41 = arith.mulf %39, %40 : vector<16x64xf32>
    %42 = arith.addf %38, %41 : vector<16x64xf32>
    %cst_28 = arith.constant 0.176776692 : f32
    %43 = vector.broadcast %cst_28 : f32 to vector<16x128xf32>
    %44 = arith.mulf %32, %43 : vector<16x128xf32>
    %45 = arith.truncf %44 : vector<16x128xf32> to vector<16x128xbf16>
    %46 = arith.truncf %42 : vector<16x64xf32> to vector<16x64xbf16>
    %47 = arith.truncf %22 : vector<16x64xf32> to vector<16x64xbf16>
    %48 = tpu.iota {dimensions = array<i32: 0>} : vector<16x16xi32>
    %49 = tpu.iota {dimensions = array<i32: 1>} : vector<16x16xi32>
    %50 = arith.cmpi sle, %49, %48 : vector<16x16xi32>
    %51 = vector.extract_strided_slice %46 {offsets = [0, 0], sizes = [16, 32], strides = [1, 1]} : vector<16x64xbf16> to vector<16x32xbf16>
    %52 = vector.extract_strided_slice %47 {offsets = [0, 0], sizes = [16, 32], strides = [1, 1]} : vector<16x64xbf16> to vector<16x32xbf16>
    %53 = vector.extract_strided_slice %45 {offsets = [0, 0], sizes = [16, 32], strides = [1, 1]} : vector<16x128xbf16> to vector<16x32xbf16>
    "tpu.trace_start"() <{level = 10 : i32, message = "qd,kd->qk"}> : () -> ()
    %cst_29 = arith.constant dense<0.000000e+00> : vector<16x16xf32>
    %54 = tpu.matmul %53, %51, %cst_29 {dimension_numbers = #tpu.dot_dimension_numbers<[1], [1], [0], [0], [0, 0, 1, 0], [], []>} : vector<16x32xbf16>, vector<16x32xbf16>, vector<16x16xf32> -> vector<16x16xf32>
    %cst_30 = arith.constant -1.000000e+30 : f32
    "tpu.trace_stop"() : () -> ()
    %55 = vector.broadcast %cst_30 : f32 to vector<16x16xf32>
    %56 = arith.select %50, %54, %55 : vector<16x16xi1>, vector<16x16xf32>
    %cst_31 = arith.constant dense<0xFF800000> : vector<16xf32>
    %57 = vector.multi_reduction <maximumf>, %56, %cst_31 [1] : vector<16x16xf32> to vector<16xf32>
    %58 = vector.shape_cast %57 : vector<16xf32> to vector<16x1xf32>
    %59 = vector.broadcast %58 : vector<16x1xf32> to vector<16x16xf32>
    %60 = arith.subf %56, %59 : vector<16x16xf32>
    %61 = math.exp %60 : vector<16x16xf32>
    %cst_32 = arith.constant dense<0.000000e+00> : vector<16xf32>
    %62 = vector.multi_reduction <add>, %61, %cst_32 [1] : vector<16x16xf32> to vector<16xf32>
    %63 = vector.shape_cast %62 : vector<16xf32> to vector<16x1xf32>
    %64 = arith.truncf %61 : vector<16x16xf32> to vector<16x16xbf16>
    %cst_33 = arith.constant dense<0.000000e+00> : vector<16x32xf32>
    %65 = tpu.matmul %64, %52, %cst_33 {dimension_numbers = #tpu.dot_dimension_numbers<[1], [0], [0], [1], [0, 0, 1, 1], [], []>} : vector<16x16xbf16>, vector<16x32xbf16>, vector<16x32xf32> -> vector<16x32xf32>
    %66 = tpu.reciprocal %63 {approx = true} : vector<16x1xf32> -> vector<16x1xf32>
    %67 = vector.broadcast %66 : vector<16x1xf32> to vector<16x32xf32>
    %68 = arith.mulf %65, %67 : vector<16x32xf32>
    %69 = arith.truncf %68 : vector<16x32xf32> to vector<16x32xbf16>
    %c0_34 = arith.constant 0 : index
    %c0_35 = arith.constant 0 : index
    %70 = vector.load %arg18[%c0_34, %c0_35] : memref<16x128xbf16, #tpu.memory_space<vmem>>, vector<16x32xbf16>
    tpu.vector_store %arg18[%c0_34, %c0_35], %69 {strides = array<i32>} : memref<16x128xbf16, #tpu.memory_space<vmem>>, vector<16x32xbf16>,
    %71 = vector.extract_strided_slice %45 {offsets = [0, 32], sizes = [16, 32], strides = [1, 1]} : vector<16x128xbf16> to vector<16x32xbf16>
    "tpu.trace_start"() <{level = 10 : i32, message = "qd,kd->qk"}> : () -> ()
    %cst_36 = arith.constant dense<0.000000e+00> : vector<16x16xf32>
    %72 = tpu.matmul %71, %51, %cst_36 {dimension_numbers = #tpu.dot_dimension_numbers<[1], [1], [0], [0], [0, 0, 1, 0], [], []>} : vector<16x32xbf16>, vector<16x32xbf16>, vector<16x16xf32> -> vector<16x16xf32>
    %cst_37 = arith.constant -1.000000e+30 : f32
    "tpu.trace_stop"() : () -> ()
    %73 = vector.broadcast %cst_37 : f32 to vector<16x16xf32>
    %74 = arith.select %50, %72, %73 : vector<16x16xi1>, vector<16x16xf32>
    %cst_38 = arith.constant dense<0xFF800000> : vector<16xf32>
    %75 = vector.multi_reduction <maximumf>, %74, %cst_38 [1] : vector<16x16xf32> to vector<16xf32>
    %76 = vector.shape_cast %75 : vector<16xf32> to vector<16x1xf32>
    %77 = vector.broadcast %76 : vector<16x1xf32> to vector<16x16xf32>
    %78 = arith.subf %74, %77 : vector<16x16xf32>
    %79 = math.exp %78 : vector<16x16xf32>
    %cst_39 = arith.constant dense<0.000000e+00> : vector<16xf32>
    %80 = vector.multi_reduction <add>, %79, %cst_39 [1] : vector<16x16xf32> to vector<16xf32>
    %81 = vector.shape_cast %80 : vector<16xf32> to vector<16x1xf32>
    %82 = arith.truncf %79 : vector<16x16xf32> to vector<16x16xbf16>
    %cst_40 = arith.constant dense<0.000000e+00> : vector<16x32xf32>
    %83 = tpu.matmul %82, %52, %cst_40 {dimension_numbers = #tpu.dot_dimension_numbers<[1], [0], [0], [1], [0, 0, 1, 1], [], []>} : vector<16x16xbf16>, vector<16x32xbf16>, vector<16x32xf32> -> vector<16x32xf32>
    %84 = tpu.reciprocal %81 {approx = true} : vector<16x1xf32> -> vector<16x1xf32>
    %85 = vector.broadcast %84 : vector<16x1xf32> to vector<16x32xf32>
    %86 = arith.mulf %83, %85 : vector<16x32xf32>
    %87 = arith.truncf %86 : vector<16x32xf32> to vector<16x32xbf16>
    %c0_41 = arith.constant 0 : index
    %c32 = arith.constant 32 : index
    %88 = vector.load %arg18[%c0_41, %c32] : memref<16x128xbf16, #tpu.memory_space<vmem>>, vector<16x32xbf16>
    tpu.vector_store %arg18[%c0_41, %c32], %87 {strides = array<i32>} : memref<16x128xbf16, #tpu.memory_space<vmem>>, vector<16x32xbf16>,
    %89 = vector.extract_strided_slice %46 {offsets = [0, 32], sizes = [16, 32], strides = [1, 1]} : vector<16x64xbf16> to vector<16x32xbf16>
    %90 = vector.extract_strided_slice %47 {offsets = [0, 32], sizes = [16, 32], strides = [1, 1]} : vector<16x64xbf16> to vector<16x32xbf16>
    %91 = vector.extract_strided_slice %45 {offsets = [0, 64], sizes = [16, 32], strides = [1, 1]} : vector<16x128xbf16> to vector<16x32xbf16>
    "tpu.trace_start"() <{level = 10 : i32, message = "qd,kd->qk"}> : () -> ()
    %cst_42 = arith.constant dense<0.000000e+00> : vector<16x16xf32>
    %92 = tpu.matmul %91, %89, %cst_42 {dimension_numbers = #tpu.dot_dimension_numbers<[1], [1], [0], [0], [0, 0, 1, 0], [], []>} : vector<16x32xbf16>, vector<16x32xbf16>, vector<16x16xf32> -> vector<16x16xf32>
    %cst_43 = arith.constant -1.000000e+30 : f32
    "tpu.trace_stop"() : () -> ()
    %93 = vector.broadcast %cst_43 : f32 to vector<16x16xf32>
    %94 = arith.select %50, %92, %93 : vector<16x16xi1>, vector<16x16xf32>
    %cst_44 = arith.constant dense<0xFF800000> : vector<16xf32>
    %95 = vector.multi_reduction <maximumf>, %94, %cst_44 [1] : vector<16x16xf32> to vector<16xf32>
    %96 = vector.shape_cast %95 : vector<16xf32> to vector<16x1xf32>
    %97 = vector.broadcast %96 : vector<16x1xf32> to vector<16x16xf32>
    %98 = arith.subf %94, %97 : vector<16x16xf32>
    %99 = math.exp %98 : vector<16x16xf32>
    %cst_45 = arith.constant dense<0.000000e+00> : vector<16xf32>
    %100 = vector.multi_reduction <add>, %99, %cst_45 [1] : vector<16x16xf32> to vector<16xf32>
    %101 = vector.shape_cast %100 : vector<16xf32> to vector<16x1xf32>
    %102 = arith.truncf %99 : vector<16x16xf32> to vector<16x16xbf16>
    %cst_46 = arith.constant dense<0.000000e+00> : vector<16x32xf32>
    %103 = tpu.matmul %102, %90, %cst_46 {dimension_numbers = #tpu.dot_dimension_numbers<[1], [0], [0], [1], [0, 0, 1, 1], [], []>} : vector<16x16xbf16>, vector<16x32xbf16>, vector<16x32xf32> -> vector<16x32xf32>
    %104 = tpu.reciprocal %101 {approx = true} : vector<16x1xf32> -> vector<16x1xf32>
    %105 = vector.broadcast %104 : vector<16x1xf32> to vector<16x32xf32>
    %106 = arith.mulf %103, %105 : vector<16x32xf32>
    %107 = arith.truncf %106 : vector<16x32xf32> to vector<16x32xbf16>
    %c0_47 = arith.constant 0 : index
    %c64 = arith.constant 64 : index
    %108 = vector.load %arg18[%c0_47, %c64] : memref<16x128xbf16, #tpu.memory_space<vmem>>, vector<16x32xbf16>
    tpu.vector_store %arg18[%c0_47, %c64], %107 {strides = array<i32>} : memref<16x128xbf16, #tpu.memory_space<vmem>>, vector<16x32xbf16>,
    %109 = vector.extract_strided_slice %45 {offsets = [0, 96], sizes = [16, 32], strides = [1, 1]} : vector<16x128xbf16> to vector<16x32xbf16>
    "tpu.trace_start"() <{level = 10 : i32, message = "qd,kd->qk"}> : () -> ()
    %cst_48 = arith.constant dense<0.000000e+00> : vector<16x16xf32>
    %110 = tpu.matmul %109, %89, %cst_48 {dimension_numbers = #tpu.dot_dimension_numbers<[1], [1], [0], [0], [0, 0, 1, 0], [], []>} : vector<16x32xbf16>, vector<16x32xbf16>, vector<16x16xf32> -> vector<16x16xf32>
    %cst_49 = arith.constant -1.000000e+30 : f32
    "tpu.trace_stop"() : () -> ()
    %111 = vector.broadcast %cst_49 : f32 to vector<16x16xf32>
    %112 = arith.select %50, %110, %111 : vector<16x16xi1>, vector<16x16xf32>
    %cst_50 = arith.constant dense<0xFF800000> : vector<16xf32>
    %113 = vector.multi_reduction <maximumf>, %112, %cst_50 [1] : vector<16x16xf32> to vector<16xf32>
    %114 = vector.shape_cast %113 : vector<16xf32> to vector<16x1xf32>
    %115 = vector.broadcast %114 : vector<16x1xf32> to vector<16x16xf32>
    %116 = arith.subf %112, %115 : vector<16x16xf32>
    %117 = math.exp %116 : vector<16x16xf32>
    %cst_51 = arith.constant dense<0.000000e+00> : vector<16xf32>
    %118 = vector.multi_reduction <add>, %117, %cst_51 [1] : vector<16x16xf32> to vector<16xf32>
    %119 = vector.shape_cast %118 : vector<16xf32> to vector<16x1xf32>
    %120 = arith.truncf %117 : vector<16x16xf32> to vector<16x16xbf16>
    %cst_52 = arith.constant dense<0.000000e+00> : vector<16x32xf32>
    %121 = tpu.matmul %120, %90, %cst_52 {dimension_numbers = #tpu.dot_dimension_numbers<[1], [0], [0], [1], [0, 0, 1, 1], [], []>} : vector<16x16xbf16>, vector<16x32xbf16>, vector<16x32xf32> -> vector<16x32xf32>
    %122 = tpu.reciprocal %119 {approx = true} : vector<16x1xf32> -> vector<16x1xf32>
    %123 = vector.broadcast %122 : vector<16x1xf32> to vector<16x32xf32>
    %124 = arith.mulf %121, %123 : vector<16x32xf32>
    %125 = arith.truncf %124 : vector<16x32xf32> to vector<16x32xbf16>
    %c0_53 = arith.constant 0 : index
    %c96 = arith.constant 96 : index
    %126 = vector.load %arg18[%c0_53, %c96] : memref<16x128xbf16, #tpu.memory_space<vmem>>, vector<16x32xbf16>
    tpu.vector_store %arg18[%c0_53, %c96], %125 {strides = array<i32>} : memref<16x128xbf16, #tpu.memory_space<vmem>>, vector<16x32xbf16>,
    %c0_54 = arith.constant 0 : index
    %c0_55 = arith.constant 0 : index
    %127 = vector.load %arg18[%c0_54, %c0_55] : memref<16x128xbf16, #tpu.memory_space<vmem>>, vector<16x128xbf16>
    %c0_56 = arith.constant 0 : index
    %c0_57 = arith.constant 0 : index
    %128 = vector.load %arg12[%c0_56, %c0_57] : memref<128x128xbf16, #tpu.memory_space<vmem>>, vector<128x128xbf16>
    %cst_58 = arith.constant dense<0.000000e+00> : vector<16x128xf32>
    %129 = tpu.matmul %127, %128, %cst_58 {dimension_numbers = #tpu.dot_dimension_numbers<[1], [0], [0], [1], [0, 0, 1, 1], [], []>} : vector<16x128xbf16>, vector<128x128xbf16>, vector<16x128xf32> -> vector<16x128xf32>
    %130 = arith.addf %2, %129 : vector<16x128xf32>
    %131 = arith.mulf %130, %130 : vector<16x128xf32>
    %cst_59 = arith.constant dense<0.000000e+00> : vector<16xf32>
    %132 = vector.multi_reduction <add>, %131, %cst_59 [1] : vector<16x128xf32> to vector<16xf32>
    %133 = vector.shape_cast %132 : vector<16xf32> to vector<16x1xf32>
    %cst_60 = arith.constant 1.280000e+02 : f32
    %134 = vector.broadcast %cst_60 : f32 to vector<16x1xf32>
    %135 = arith.divf %133, %134 : vector<16x1xf32>
    %c0_61 = arith.constant 0 : index
    %c0_62 = arith.constant 0 : index
    %136 = vector.load %arg13[%c0_61, %c0_62] : memref<1x128xbf16, #tpu.memory_space<vmem>>, vector<1x128xbf16>
    %cst_63 = arith.constant 9.99999974E-6 : f32
    %137 = vector.broadcast %cst_63 : f32 to vector<16x1xf32>
    %138 = arith.addf %135, %137 : vector<16x1xf32>
    %139 = math.rsqrt %138 : vector<16x1xf32>
    %140 = vector.broadcast %139 : vector<16x1xf32> to vector<16x128xf32>
    %141 = arith.mulf %130, %140 : vector<16x128xf32>
    %142 = arith.truncf %141 : vector<16x128xf32> to vector<16x128xbf16>
    %143 = vector.broadcast %136 : vector<1x128xbf16> to vector<16x128xbf16>
    %144 = arith.mulf %143, %142 : vector<16x128xbf16>
    %c0_64 = arith.constant 0 : index
    %c0_65 = arith.constant 0 : index
    %145 = vector.load %arg14[%c0_64, %c0_65] : memref<128x256xbf16, #tpu.memory_space<vmem>>, vector<128x256xbf16>
    %cst_66 = arith.constant dense<0.000000e+00> : vector<16x256xf32>
    %146 = tpu.matmul %144, %145, %cst_66 {dimension_numbers = #tpu.dot_dimension_numbers<[1], [0], [0], [1], [0, 0, 1, 1], [], []>} : vector<16x128xbf16>, vector<128x256xbf16>, vector<16x256xf32> -> vector<16x256xf32>
    %c0_67 = arith.constant 0 : index
    %c0_68 = arith.constant 0 : index
    %147 = vector.load %arg15[%c0_67, %c0_68] : memref<128x256xbf16, #tpu.memory_space<vmem>>, vector<128x256xbf16>
    %cst_69 = arith.constant dense<0.000000e+00> : vector<16x256xf32>
    %148 = tpu.matmul %144, %147, %cst_69 {dimension_numbers = #tpu.dot_dimension_numbers<[1], [0], [0], [1], [0, 0, 1, 1], [], []>} : vector<16x128xbf16>, vector<128x256xbf16>, vector<16x256xf32> -> vector<16x256xf32>
    %149 = arith.negf %146 : vector<16x256xf32>
    %150 = math.exp %149 : vector<16x256xf32>
    %cst_70 = arith.constant 1.000000e+00 : f32
    %151 = vector.broadcast %cst_70 : f32 to vector<16x256xf32>
    %152 = arith.addf %151, %150 : vector<16x256xf32>
    %153 = arith.divf %151, %152 : vector<16x256xf32>
    %154 = arith.mulf %146, %153 : vector<16x256xf32>
    %155 = arith.mulf %154, %148 : vector<16x256xf32>
    %156 = arith.truncf %155 : vector<16x256xf32> to vector<16x256xbf16>
    %c0_71 = arith.constant 0 : index
    %c0_72 = arith.constant 0 : index
    %157 = vector.load %arg16[%c0_71, %c0_72] : memref<256x128xbf16, #tpu.memory_space<vmem>>, vector<256x128xbf16>
    %cst_73 = arith.constant dense<0.000000e+00> : vector<16x128xf32>
    %158 = tpu.matmul %156, %157, %cst_73 {dimension_numbers = #tpu.dot_dimension_numbers<[1], [0], [0], [1], [0, 0, 1, 1], [], []>} : vector<16x256xbf16>, vector<256x128xbf16>, vector<16x128xf32> -> vector<16x128xf32>
    %159 = arith.addf %130, %158 : vector<16x128xf32>
    %160 = arith.truncf %159 : vector<16x128xf32> to vector<16x128xbf16>
    %c0_74 = arith.constant 0 : index
    %c0_75 = arith.constant 0 : index
    %c0_76 = arith.constant 0 : index
    %161 = vector.load %arg17[%c0_74, %c0_75, %c0_76] : memref<1x16x128xbf16, #tpu.memory_space<vmem>>, vector<1x16x128xbf16>
    %162 = vector.shape_cast %161 : vector<1x16x128xbf16> to vector<16x128xbf16>
    %163 = vector.shape_cast %160 : vector<16x128xbf16> to vector<1x16x128xbf16>
    tpu.vector_store %arg17[%c0_74, %c0_75, %c0_76], %163 {strides = array<i32>} : memref<1x16x128xbf16, #tpu.memory_space<vmem>>, vector<1x16x128xbf16>,
    return
  }
  func.func @transform_0(%arg0: i32) -> (i32, i32, i32) {
    %c0_i32 = arith.constant 0 : i32
    %c0_i32_0 = arith.constant 0 : i32
    %c0_i32_1 = arith.constant 0 : i32
    return %arg0, %c0_i32, %c0_i32_0 : i32, i32, i32
  }
  func.func @transform_1(%arg0: i32) -> (i32, i32) {
    %c0_i32 = arith.constant 0 : i32
    %c0_i32_0 = arith.constant 0 : i32
    %c0_i32_1 = arith.constant 0 : i32
    return %c0_i32, %c0_i32_0 : i32, i32
  }
  func.func @transform_2(%arg0: i32) -> (i32, i32) {
    %c0_i32 = arith.constant 0 : i32
    %c0_i32_0 = arith.constant 0 : i32
    %c0_i32_1 = arith.constant 0 : i32
    return %c0_i32, %c0_i32_0 : i32, i32
  }
  func.func @transform_3(%arg0: i32) -> (i32, i32) {
    %c0_i32 = arith.constant 0 : i32
    %c0_i32_0 = arith.constant 0 : i32
    %c0_i32_1 = arith.constant 0 : i32
    return %c0_i32, %c0_i32_0 : i32, i32
  }
  func.func @transform_4(%arg0: i32) -> (i32, i32) {
    %c0_i32 = arith.constant 0 : i32
    %c0_i32_0 = arith.constant 0 : i32
    %c0_i32_1 = arith.constant 0 : i32
    return %c0_i32, %c0_i32_0 : i32, i32
  }
  func.func @transform_5(%arg0: i32) -> (i32, i32) {
    %c0_i32 = arith.constant 0 : i32
    %c0_i32_0 = arith.constant 0 : i32
    %c0_i32_1 = arith.constant 0 : i32
    return %c0_i32, %c0_i32_0 : i32, i32
  }
  func.func @transform_6(%arg0: i32) -> (i32, i32) {
    %c0_i32 = arith.constant 0 : i32
    %c0_i32_0 = arith.constant 0 : i32
    %c0_i32_1 = arith.constant 0 : i32
    return %c0_i32, %c0_i32_0 : i32, i32
  }
  func.func @transform_7(%arg0: i32) -> (i32, i32) {
    %c0_i32 = arith.constant 0 : i32
    %c0_i32_0 = arith.constant 0 : i32
    %c0_i32_1 = arith.constant 0 : i32
    return %c0_i32, %c0_i32_0 : i32, i32
  }
  func.func @transform_8(%arg0: i32) -> (i32, i32) {
    %c0_i32 = arith.constant 0 : i32
    %c0_i32_0 = arith.constant 0 : i32
    %c0_i32_1 = arith.constant 0 : i32
    return %c0_i32, %c0_i32_0 : i32, i32
  }
  func.func @transform_9(%arg0: i32) -> (i32, i32) {
    %c0_i32 = arith.constant 0 : i32
    %c0_i32_0 = arith.constant 0 : i32
    %c0_i32_1 = arith.constant 0 : i32
    return %c0_i32, %c0_i32_0 : i32, i32
  }
  func.func @transform_10(%arg0: i32) -> (i32, i32) {
    %c0_i32 = arith.constant 0 : i32
    %c0_i32_0 = arith.constant 0 : i32
    %c0_i32_1 = arith.constant 0 : i32
    return %c0_i32, %c0_i32_0 : i32, i32
  }
  func.func @transform_11(%arg0: i32) -> (i32, i32) {
    %c0_i32 = arith.constant 0 : i32
    %c0_i32_0 = arith.constant 0 : i32
    %c0_i32_1 = arith.constant 0 : i32
    return %c0_i32, %c0_i32_0 : i32, i32
  }
  func.func @transform_12(%arg0: i32) -> (i32, i32) {
    %c0_i32 = arith.constant 0 : i32
    %c0_i32_0 = arith.constant 0 : i32
    %c0_i32_1 = arith.constant 0 : i32
    return %c0_i32, %c0_i32_0 : i32, i32
  }
  func.func @transform_13(%arg0: i32) -> (i32, i32) {
    %c0_i32 = arith.constant 0 : i32
    %c0_i32_0 = arith.constant 0 : i32
    %c0_i32_1 = arith.constant 0 : i32
    return %c0_i32, %c0_i32_0 : i32, i32
  }
  func.func @transform_14(%arg0: i32) -> (i32, i32) {
    %c0_i32 = arith.constant 0 : i32
    %c0_i32_0 = arith.constant 0 : i32
    %c0_i32_1 = arith.constant 0 : i32
    return %c0_i32, %c0_i32_0 : i32, i32
  }
  func.func @transform_15(%arg0: i32) -> (i32, i32) {
    %c0_i32 = arith.constant 0 : i32
    %c0_i32_0 = arith.constant 0 : i32
    %c0_i32_1 = arith.constant 0 : i32
    return %c0_i32, %c0_i32_0 : i32, i32
  }
  func.func @transform_16(%arg0: i32) -> (i32, i32, i32) {
    %c0_i32 = arith.constant 0 : i32
    %c0_i32_0 = arith.constant 0 : i32
    %c0_i32_1 = arith.constant 0 : i32
    return %arg0, %c0_i32, %c0_i32_0 : i32, i32, i32
  }
}

</mosaic_0001>

<bundles_post_ra>
// kernel: tpu_custom_call.1
= control target key start
LH: loop header
LB: loop body
LE: loop exit
PB: predicated region body
PF: predicated region fallthrough
CT: control target
= control target key end

     0   :  { %s4077_s0 = inlined_call_operand.vmem [shape: bf16[2,16,128], index: 0, kind: input, shape index: {}]   ;;  %s4078_s1 = inlined_call_operand.vmem [shape: f32[16,128], index: 1, kind: input, shape index: {}]   ;;  %s4079_s2 = inlined_call_operand.vmem [shape: f32[16,128], index: 2, kind: input, shape index: {}]   ;;  %s4080_s3 = inlined_call_operand.hbm [shape: f32[16,128], index: 3, kind: input, shape index: {}]   ;;  %s4081_s4 = inlined_call_operand.hbm [shape: f32[16,64], index: 4, kind: input, shape index: {}]   ;;  %s4082_s5 = inlined_call_operand.hbm [shape: f32[16,64], index: 5, kind: input, shape index: {}]   ;;  %s4083_s6 = inlined_call_operand.hbm [shape: f32[16,64], index: 6, kind: input, shape index: {}]   ;;  %s4084_s7 = inlined_call_operand.vmem [shape: bf16[1,128], index: 7, kind: input, shape index: {}]   ;;  %s4085_s8 = inlined_call_operand.vmem [shape: bf16[128,128], index: 8, kind: input, shape index: {}]   ;;  %s4086_s9 = inlined_call_operand.vmem [shape: bf16[128,64], index: 9, kind: input, shape index: {}]   ;;  %s4087_s10 = inlined_call_operand.vmem [shape: bf16[128,64], index: 10, kind: input, shape index: {}]   ;;  %s4088_s11 = inlined_call_operand.hbm [shape: bf16[128,128], index: 11, kind: input, shape index: {}]   ;;  %s4089_s12 = inlined_call_operand.hbm [shape: bf16[1,128], index: 12, kind: input, shape index: {}]   ;;  %s4090_s13 = inlined_call_operand.vmem [shape: bf16[128,256], index: 13, kind: input, shape index: {}]   ;;  %s4091_s14 = inlined_call_operand.hbm [shape: bf16[128,256], index: 14, kind: input, shape index: {}]   ;;  %s4092_s15 = inlined_call_operand.hbm [shape: bf16[256,128], index: 15, kind: input, shape index: {}]   ;;  %s4093_s16 = inlined_call_operand.hbm [shape: bf16[2,16,128], index: 16, kind: output, shape index: {}]  }
   0x1   :  { %4112 = sst [smem:[#allocation32_spill]] %s4077_s0 }
   0x2   :  { %4113 = sst [smem:[#allocation33_spill]] %s4078_s1 }
   0x3   :  { %4114 = sst [smem:[#allocation34_spill]] %s4080_s3 }
   0x4   :  { %4115 = sst [smem:[#allocation35_spill]] %s4090_s13 }
   0x5   :  { %4116 = sst [smem:[#allocation36_spill]] %s4093_s16 }
   0x6   :  { %21 = vsyncpa [#allocation4], 0 }
   0x7   :  { %22 = vsyncpa [#allocation7], 0 }
   0x8   :  { %23 = vsyncpa [#allocation10], 0 }
   0x9   :  { %24 = vsyncpa [#allocation13], 0 }
   0xa   :  { %25 = vsyncpa [#allocation16], 0 }
   0xb   :  { %26 = vsyncpa [#allocation5], 0 }
   0xc   :  { %28 = vsyncpa [#allocation5 + $0x1], 0  ;;  %s3395_s21 = smov 0   ;;  %s3397_s22 = smov 0  }
   0xd   :  { %s3399_s23 = smov 0   ;;  %s3401_s24 = smov 0  }
   0xe LB: > { %4117 = sst [smem:[#allocation24_spill]] %s3272_s21  ;;  %s3416_s25 = sadd.s32 4294967295, %s3284_s24   ;;  %s3284_s24 = sphi %s3401_s24, %s4155_s24   ;;  %s3280_s23 = sphi %s3399_s23, %s4158_s23   ;;  %s3276_s22 = sphi %s3397_s22, %s4157_s22   ;;  %s3272_s21 = sphi %s3395_s21, %s4156_s21  }
   0xf   : > { %4118 = sst [smem:[#allocation25_spill]] %s3276_s22  ;;  %s2354_s26 = sadd.s32 4294967294, %s3284_s24  }
  0x10   : > { %4119 = sst [smem:[#allocation26_spill]] %s3280_s23  ;;  %s3420_s27 = sadd.s32 1, %s3284_s24  }
  0x11   : > { %4120 = sst [smem:[#allocation27_spill]] %s3284_s24  ;;  %s382_s28 = sadd.s32 1, %s3280_s23 }
  0x12   : > { %4121 = sst [smem:[#allocation28_spill]] %s3420_s27  ;;  %s379_s29 = ssub.s32 %s3284_s24, %s3420_s27 }
  0x13   : > { %p392_p0 = scmp.ne.s32.totalorder %s3280_s23, %s3276_s22  ;;  %p380_p1 = scmp.eq.s32.totalorder %s379_s29, 0 }
  0x14   : > { %p393_p2 = scmp.eq.s32.totalorder %s3416_s25, 1  ;;  %p398_p3 = scmp.ne.s32.totalorder %s3276_s22, %s3272_s21 }
  0x15   : > { %p399_p4 = scmp.eq.s32.totalorder %s2354_s26, 1  ;;  %p2355_p7 = scmp.ge.s32.totalorder %s3284_s24, 1 }
  0x16   : > { %s3431_s30 = scalar_select %p380_p1, %s3280_s23, %s382_s28  }
  0x17   : > { %p3433_p5 = por %p393_p2, %p392_p0  ;;  %p3437_p6 = por %p399_p4, %p398_p3 }
  0x18   : > { %4122 = sst [smem:[#allocation29_spill]] %s3431_s30  ;;  %p406_p8 = scmp.lt.s32.totalorder %s3284_s24, 3 }
  0x19   : > { %s4123_s0 = scalar_select %p3433_p5, 1, 0 }
  0x1a   : > { %s4125_s17 = scalar_select %p3437_p6, 1, 0 }
  0x1b   : > { %4124 = sst [smem:[#allocation30_spill]] %s4123_s0  ;;  %p4101_p9 = scmp.eq.s32.totalorder %s3416_s25, 0 }
  0x1c   : > { %4126 = sst [smem:[#allocation31_spill]] %s4125_s17  ;;  %p3444_p10 = pnand %p2355_p7, %p406_p8 }
  0x1d   : > { %s3286_s19 = smov [#allocation6]   ;;  %s3287_s28 = smov [#allocation9]  }
  0x1e   : > { %s4127_s18 = scalar_select %p3444_p10, 1, 0 }
  0x1f   : > { %p2725_p11 = pneg %p3444_p10  ;;  %s437_s20 = sshll.u32 %s3286_s19, 4  ;;  %s3450_s20 = int_to_ptr.vmem [resolvable:$true] %s437_s20 }
  0x20   : > { %s463_s29 = sshll.u32 %s3287_s28, 4  ;;  %s3288_s30 = smov [#allocation12]   ;;  %s3458_s29 = int_to_ptr.vmem [resolvable:$true] %s463_s29 }
  0x21   : > { %p3454_p12 = pnand %p4101_p9, %p2725_p11  ;;  %s3460_s23 = sshll.u32 %s3288_s30, 4  ;;  %s503_s23 = int_to_ptr.vmem [resolvable:$true] %s3460_s23 }
  0x22   : > { %s2978_s21 = scalar_lea.hbm %s4081_s4, 256 }
  0x23   : > { %p2979_p13 = scmp.ne.s32.totalorder %s4081_s4, %s2978_s21  ;;  %p3470_p0 = pneg %p3454_p12 }
  0x24   : > { %p2985_p3 = scmp.lt.u32.totalorder %s2978_s21, %s4081_s4 }
  0x25   : > { %p2981_p1 = pnand %p3470_p0, %p2979_p13 }
  0x27   : > { %p2982_p2 = pneg %p2981_p1 }
  0x29   : > { %p2987_p4 = pnand %p2985_p3, %p2982_p2 }
  0x2b   : > { %2990 = shalt.err (!%p2987_p4)
}
  0x2c   : > { %s2991_s24 = scalar_lea.vmem %s3450_s20, 256  ;;  %p2999_p9 = scmp.lt.s32.totalorder %s3450_s20, %s3450_s20 }
  0x2d   : > { %p2992_p7 = scmp.ne.s32.totalorder %s3450_s20, %s2991_s24  ;;  %p3000_p6 = scmp.lt.s32.totalorder %s2991_s24, %s2991_s24 }
  0x2f   : > { %p2994_p8 = pnand %p2992_p7, %p3470_p0  ;;  %p3001_p13 = por %p3000_p6, %p2999_p9 }
  0x31   : > { %p2995_p11 = pneg %p2994_p8 }
  0x33   : > { %p3002_p1 = pnand %p3001_p13, %p2995_p11 }
  0x35   : > { %3005 = shalt.err (!%p3002_p1)
}
  0x36   : > { %s4109_s27 = smov 128   ;;  %s4111_s21 = smov 8  }
  0x37   : > { %2731 = dma.hbm_to_vmem [thread:$0]  (!%p3454_p12), %s4081_s4, 256, %s3450_s20, [#allocation7], %s4109_s27, %s4109_s27, %s4111_s21  }
  0x38   : > { %s3006_s24 = scalar_lea.hbm %s4083_s6, 256 }
  0x39   : > { %p3007_p6 = scmp.ne.s32.totalorder %s4083_s6, %s3006_s24  ;;  %p3013_p3 = scmp.lt.u32.totalorder %s3006_s24, %s4083_s6 }
  0x3b   : > { %p3009_p9 = pnand %p3007_p6, %p3470_p0 }
  0x3d   : > { %p3010_p2 = pneg %p3009_p9 }
  0x3f   : > { %p3015_p4 = pnand %p3013_p3, %p3010_p2 }
  0x41   : > { %3018 = shalt.err (!%p3015_p4)
}
  0x42   : > { %s3019_s20 = scalar_lea.vmem %s3458_s29, 256  ;;  %p3027_p13 = scmp.lt.s32.totalorder %s3458_s29, %s3458_s29 }
  0x43   : > { %p3020_p7 = scmp.ne.s32.totalorder %s3458_s29, %s3019_s20  ;;  %p3028_p1 = scmp.lt.s32.totalorder %s3019_s20, %s3019_s20 }
  0x45   : > { %p3022_p8 = pnand %p3020_p7, %p3470_p0  ;;  %p3029_p6 = por %p3028_p1, %p3027_p13 }
  0x47   : > { %p3023_p11 = pneg %p3022_p8 }
  0x49   : > { %p3030_p9 = pnand %p3029_p6, %p3023_p11 }
  0x4b   : > { %3033 = shalt.err (!%p3030_p9)
}
  0x4c   : > { %2737 = dma.hbm_to_vmem [thread:$0]  (!%p3454_p12), %s4083_s6, 256, %s3458_s29, [#allocation10], %s4109_s27, %s4109_s27, %s4111_s21  }
  0x4d   : > { %s3034_s17 = scalar_lea.hbm %s4089_s12, 16 }
  0x4e   : > { %p3035_p2 = scmp.ne.s32.totalorder %s4089_s12, %s3034_s17  ;;  %p3041_p7 = scmp.lt.u32.totalorder %s3034_s17, %s4089_s12 }
  0x50   : > { %p3037_p3 = pnand %p3035_p2, %p3470_p0 }
  0x52   : > { %p3038_p4 = pneg %p3037_p3 }
  0x54   : > { %p3043_p8 = pnand %p3041_p7, %p3038_p4 }
  0x56   : > { %3046 = shalt.err (!%p3043_p8)
}
  0x57   : > { %s3047_s20 = scalar_lea.vmem %s503_s23, 16  ;;  %s3054_s29 = scalar_lea.vmem %s503_s23, 32 }
  0x58   : > { %p3048_p11 = scmp.ne.s32.totalorder %s503_s23, %s3047_s20  ;;  %p3055_p6 = scmp.lt.s32.totalorder %s503_s23, %s503_s23 }
  0x59   : > { %p3056_p9 = scmp.lt.s32.totalorder %s3054_s29, %s3047_s20 }
  0x5a   : > { %p3050_p13 = pnand %p3048_p11, %p3470_p0 }
  0x5b   : > { %p3057_p5 = por %p3056_p9, %p3055_p6 }
  0x5c   : > { %p3051_p1 = pneg %p3050_p13 }
  0x5e   : > { %p3058_p10 = pnand %p3057_p5, %p3051_p1 }
  0x60   : > { %3061 = shalt.err (!%p3058_p10)
}
  0x61   : > { %2743 = dma.hbm_to_vmem [thread:$0]  (!%p3454_p12), %s4089_s12, 16, %s503_s23, [#allocation13]  }
  0x62   : > { %s3291_s22 = smov [#allocation3]   ;;  %s3292_s17 = smov [#allocation8]  }
  0x63   : > { %s424_s0 = sshll.u32 %s3291_s22, 4  ;;  %s450_s19 = sshll.u32 %s3292_s17, 4  ;;  %s425_s0 = int_to_ptr.vmem [resolvable:$true] %s424_s0  ;;  %s451_s19 = int_to_ptr.vmem [resolvable:$true] %s450_s19 }
  0x64   : > { %s4130_s3 = sld [smem:[#allocation34_spill]] }
  0x6a   : > { %s3062_s24 = scalar_lea.hbm %s4130_s3, 256 }
  0x6b   : > { %p3063_p5 = scmp.ne.s32.totalorder %s4130_s3, %s3062_s24  ;;  %p3069_p3 = scmp.lt.u32.totalorder %s3062_s24, %s4130_s3 }
  0x6d   : > { %p3065_p10 = pnand %p3063_p5, %p3470_p0 }
  0x6f   : > { %p3066_p2 = pneg %p3065_p10 }
  0x71   : > { %p3071_p4 = pnand %p3069_p3, %p3066_p2 }
  0x73   : > { %3074 = shalt.err (!%p3071_p4)
}
  0x74   : > { %s3075_s23 = scalar_lea.vmem %s425_s0, 256  ;;  %p3083_p13 = scmp.lt.s32.totalorder %s425_s0, %s425_s0 }
  0x75   : > { %p3076_p7 = scmp.ne.s32.totalorder %s425_s0, %s3075_s23  ;;  %p3084_p1 = scmp.lt.s32.totalorder %s3075_s23, %s3075_s23 }
  0x77   : > { %p3078_p8 = pnand %p3076_p7, %p3470_p0  ;;  %p3085_p6 = por %p3084_p1, %p3083_p13 }
  0x79   : > { %p3079_p11 = pneg %p3078_p8 }
  0x7b   : > { %p3086_p9 = pnand %p3085_p6, %p3079_p11 }
  0x7d   : > { %3089 = shalt.err (!%p3086_p9)
}
  0x7e   : > { %s4131_s13 = smov 128   ;;  %s3090_s30 = scalar_lea.hbm %s4082_s5, 256 }
  0x7f   : > { %2728 = dma.hbm_to_vmem [thread:$0]  (!%p3454_p12), %s4130_s3, 256, %s425_s0, [#allocation4], %s4131_s13, %s4131_s13, %s4111_s21  }
  0x80   : > { %p3091_p5 = scmp.ne.s32.totalorder %s4082_s5, %s3090_s30  ;;  %p3097_p3 = scmp.lt.u32.totalorder %s3090_s30, %s4082_s5 }
  0x82   : > { %p3093_p10 = pnand %p3091_p5, %p3470_p0 }
  0x84   : > { %p3094_p2 = pneg %p3093_p10 }
  0x86   : > { %p3099_p4 = pnand %p3097_p3, %p3094_p2 }
  0x88   : > { %3102 = shalt.err (!%p3099_p4)
}
  0x89   : > { %s3103_s23 = scalar_lea.vmem %s451_s19, 256  ;;  %p3111_p13 = scmp.lt.s32.totalorder %s451_s19, %s451_s19 }
  0x8a   : > { %p3104_p7 = scmp.ne.s32.totalorder %s451_s19, %s3103_s23  ;;  %p3112_p1 = scmp.lt.s32.totalorder %s3103_s23, %s3103_s23 }
  0x8c   : > { %p3106_p8 = pnand %p3104_p7, %p3470_p0  ;;  %p3113_p6 = por %p3112_p1, %p3111_p13 }
  0x8e   : > { %p3107_p11 = pneg %p3106_p8 }
  0x90   : > { %p3114_p9 = pnand %p3113_p6, %p3107_p11 }
  0x92   : > { %3117 = shalt.err (!%p3114_p9)
}
  0x93   : > { %2734 = dma.hbm_to_vmem [thread:$0]  (!%p3454_p12), %s4082_s5, 256, %s451_s19, [#allocation7], %s4131_s13, %s4131_s13, %s4111_s21  }
  0x94   : > { %s3293_s22 = smov [#allocation11]   ;;  %s3118_s24 = scalar_lea.hbm %s4088_s11, 1024 }
  0x95   : > { %s488_s17 = sshll.u32 %s3293_s22, 4  ;;  %p3119_p5 = scmp.ne.s32.totalorder %s4088_s11, %s3118_s24  ;;  %s489_s17 = int_to_ptr.vmem [resolvable:$true] %s488_s17 }
  0x96   : > { %p3125_p3 = scmp.lt.u32.totalorder %s3118_s24, %s4088_s11 }
  0x97   : > { %p3121_p10 = pnand %p3119_p5, %p3470_p0 }
  0x99   : > { %p3122_p2 = pneg %p3121_p10 }
  0x9b   : > { %p3127_p4 = pnand %p3125_p3, %p3122_p2 }
  0x9d   : > { %3130 = shalt.err (!%p3127_p4)
}
  0x9e   : > { %s3131_s19 = scalar_lea.vmem %s489_s17, 1024  ;;  %p3139_p13 = scmp.lt.s32.totalorder %s489_s17, %s489_s17 }
  0x9f   : > { %p3132_p7 = scmp.ne.s32.totalorder %s489_s17, %s3131_s19  ;;  %p3140_p1 = scmp.lt.s32.totalorder %s3131_s19, %s3131_s19 }
  0xa1   : > { %p3134_p8 = pnand %p3132_p7, %p3470_p0  ;;  %p3141_p6 = por %p3140_p1, %p3139_p13 }
  0xa3   : > { %p3135_p11 = pneg %p3134_p8 }
  0xa5   : > { %p3142_p9 = pnand %p3141_p6, %p3135_p11 }
  0xa7   : > { %3145 = shalt.err (!%p3142_p9)
}
  0xa8   : > { %s3294_s0 = smov 64   ;;  %s3295_s27 = smov 4  }
  0xa9   : > { %2740 = dma.hbm_to_vmem [thread:$0]  (!%p3454_p12), %s4088_s11, 1024, %s489_s17, [#allocation10], %s3294_s0, %s3294_s0, %s3295_s27  }
  0xaa   : > { %s3296_s30 = smov [#allocation14]   ;;  %s3297_s20 = smov [#allocation15]  }
  0xab   : > { %s515_s24 = sshll.u32 %s3296_s30, 4  ;;  %s528_s29 = sshll.u32 %s3297_s20, 4  ;;  %s516_s24 = int_to_ptr.vmem [resolvable:$true] %s515_s24  ;;  %s3602_s29 = int_to_ptr.vmem [resolvable:$true] %s528_s29 }
  0xac   : > { %s3146_s19 = scalar_lea.hbm %s4091_s14, 2048 }
  0xad   : > { %p3147_p5 = scmp.ne.s32.totalorder %s4091_s14, %s3146_s19  ;;  %p3153_p3 = scmp.lt.u32.totalorder %s3146_s19, %s4091_s14 }
  0xaf   : > { %p3149_p10 = pnand %p3147_p5, %p3470_p0 }
  0xb1   : > { %p3150_p2 = pneg %p3149_p10 }
  0xb3   : > { %p3155_p4 = pnand %p3153_p3, %p3150_p2 }
  0xb5   : > { %3158 = shalt.err (!%p3155_p4)
}
  0xb6   : > { %s3159_s28 = scalar_lea.vmem %s516_s24, 2048  ;;  %p3167_p13 = scmp.lt.s32.totalorder %s516_s24, %s516_s24 }
  0xb7   : > { %p3160_p7 = scmp.ne.s32.totalorder %s516_s24, %s3159_s28  ;;  %p3168_p1 = scmp.lt.s32.totalorder %s3159_s28, %s3159_s28 }
  0xb9   : > { %p3162_p8 = pnand %p3160_p7, %p3470_p0  ;;  %p3169_p6 = por %p3168_p1, %p3167_p13 }
  0xbb   : > { %p3163_p11 = pneg %p3162_p8 }
  0xbd   : > { %p3170_p9 = pnand %p3169_p6, %p3163_p11 }
  0xbf   : > { %3173 = shalt.err (!%p3170_p9)
}
  0xc0   : > { %s4132_s3 = smov 8   ;;  %s3174_s23 = scalar_lea.hbm %s4092_s15, 2048 }
  0xc1   : > { %2746 = dma.hbm_to_vmem [thread:$0]  (!%p3454_p12), %s4091_s14, 2048, %s516_s24, [#allocation13], %s4131_s13, %s4131_s13, %s4132_s3  }
  0xc2   : > { %p3175_p5 = scmp.ne.s32.totalorder %s4092_s15, %s3174_s23  ;;  %p3181_p3 = scmp.lt.u32.totalorder %s3174_s23, %s4092_s15 }
  0xc4   : > { %p3177_p10 = pnand %p3175_p5, %p3470_p0 }
  0xc6   : > { %p3178_p2 = pneg %p3177_p10 }
  0xc8   : > { %p3183_p4 = pnand %p3181_p3, %p3178_p2 }
  0xca   : > { %3186 = shalt.err (!%p3183_p4)
}
  0xcb   : > { %s3187_s13 = scalar_lea.vmem %s3602_s29, 2048  ;;  %p3195_p13 = scmp.lt.s32.totalorder %s3602_s29, %s3602_s29 }
  0xcc   : > { %p3188_p7 = scmp.ne.s32.totalorder %s3602_s29, %s3187_s13  ;;  %p3196_p1 = scmp.lt.s32.totalorder %s3187_s13, %s3187_s13 }
  0xce   : > { %p3190_p8 = pnand %p3188_p7, %p3470_p0  ;;  %p3197_p6 = por %p3196_p1, %p3195_p13 }
  0xd0   : > { %p3191_p11 = pneg %p3190_p8 }
  0xd2   : > { %p3198_p9 = pnand %p3197_p6, %p3191_p11 }
  0xd4   : > { %3201 = shalt.err (!%p3198_p9)
}
  0xd5   : > { %2749 = dma.hbm_to_vmem [thread:$0]  (!%p3454_p12), %s4092_s15, 2048, %s3602_s29, [#allocation16], %s3294_s0, %s3294_s0, %s3295_s27  }
  0xd6   : > { %p4133_p5 = scmp.ne.s32.totalorder %s4127_s18, 0 }
  0xd7   : > { %p4134_p0 = scmp.eq.s32.totalorder (!%p4133_p5), %s3416_s25, 0 }
  0xd8   : > { %552 = sbr.rel (%p4133_p5) target bundleno = 2976 (0xba0), region = 84 }
  0xdf   : > { %3247 = dma.done.wait (%p4134_p0), [#allocation4], 256   ;;  %p4135_p10 = pmov %p4134_p0 }
  0xe0   : > { %p4136_p2 = pmov %p4134_p0 }
  0xe1   : > { %3249 = vsyncadd (%p4135_p10), [#allocation4], 4294967040 }
  0xe2   : > { %3251 = dma.done.wait (%p4136_p2), [#allocation7], 512   ;;  %p4137_p3 = pmov %p4134_p0 }
  0xe3   : > { %p4138_p4 = pmov %p4134_p0 }
  0xe4   : > { %3253 = vsyncadd (%p4137_p3), [#allocation7], 4294966784 }
  0xe5   : > { %3255 = dma.done.wait (%p4138_p4), [#allocation10], 1280   ;;  %p4139_p12 = pmov %p4134_p0 }
  0xe6   : > { %p4140_p7 = pmov %p4134_p0 }
  0xe7   : > { %3257 = vsyncadd (%p4139_p12), [#allocation10], 4294966016 }
  0xe8   : > { %3259 = dma.done.wait (%p4140_p7), [#allocation13], 2064   ;;  %p4141_p8 = pmov %p4134_p0 }
  0xe9   : > { %p4142_p11 = pmov %p4134_p0 }
  0xea   : > { %3261 = vsyncadd (%p4141_p8), [#allocation13], 4294965232 }
  0xeb   : > { %3263 = dma.done.wait (%p4142_p11), [#allocation16], 2048   ;;  %p4143_p13 = pmov %p4134_p0 }
  0xec   : > { %p630_p1 = scmp.lt.s32.totalorder %s3416_s25, 1  ;;  %v3298_v0 = vmov 0.0   ;;  %s4144_s27 = sld [smem:[#allocation32_spill]]  ;;  %v2826_v4 = vld [vmem:[%s4085_s8] sm:$0xff]   ;;  %v2828_v7 = vld [vmem:[%s4085_s8 + $0x8] sm:$0xff]   ;;  %v2830_v10 = vld [vmem:[%s4085_s8 + $0x10] sm:$0xff]   ;;  %v660_v28 = vlaneseq }
  0xed   : > { %3265 = vsyncadd (%p4143_p13), [#allocation16], 4294965248  ;;  %2563 = vmatprep.subr.bf16.mxu0 %v3298_v0  ;;  %2583 = vmatprep.subr.bf16.mxu1 %v3298_v0  ;;  %v2827_v5 = vld [vmem:[%s4086_s9] sm:$0xff]   ;;  %v2829_v8 = vld [vmem:[%s4086_s9 + $0x8] sm:$0xff]   ;;  %vm3299_vm0 = vmmov 0   ;;  %s3300_s26 = smov 64  }
  0xee   : > { %s631_s16 = scalar_select %p630_p1, %s3416_s25, 1  ;;  %2564 = vmatpush3.bf16.msra.mxu0 %v2826_v4  ;;  %2584 = vmatpush3.bf16.msra.mxu1 %v2827_v5  ;;  %v2831_v11 = vld [vmem:[%s4086_s9 + $0x10] sm:$0xff]   ;;  %v2832_v12 = vld [vmem:[%s4085_s8 + $0x18] sm:$0xff]   ;;  %v2834_v14 = vld [vmem:[%s4085_s8 + $0x20] sm:$0xff]   ;;  %v3757_v29 = vshrl.u32 %v660_v28, 7  ;;  %vm1008_vm1 = vcmask 1048064  }
  0xef   : > { %2565 = vmatprep.subr.bf16.mxu0 %v3298_v0  ;;  %2585 = vmatprep.subr.bf16.mxu1 %v3298_v0  ;;  %v2833_v13 = vld [vmem:[%s4086_s9 + $0x18] sm:$0xff]   ;;  %v2835_v15 = vld [vmem:[%s4086_s9 + $0x20] sm:$0xff]   ;;  %v2836_v16 = vld [vmem:[%s4085_s8 + $0x28] sm:$0xff]   ;;  %s3301_s0 = smov 16   ;;  %s3304_s21 = smov 80   ;;  %vm1077_vm2 = vcmask 261120  }
  0xf0   : > { %s2476_s18 = sshll.u32 %s631_s16, 3  ;;  %2579 = vmatprep.mubr.msk.bf16.mxu0 %vm3299_vm0, %v3298_v0  ;;  %v2837_v17 = vld [vmem:[%s4086_s9 + $0x28] sm:$0xff]   ;;  %v2838_v18 = vld [vmem:[%s4085_s8 + $0x30] sm:$0xff]   ;;  %2599 = vmatprep.mubr.msk.bf16.mxu1 %vm3299_vm0, %v3298_v0  ;;  %v2840_v20 = vld [vmem:[%s4085_s8 + $0x38] sm:$0xff]   ;;  %v662_v32 = vsub.s32 0, %v3757_v29  ;;  %s4145_s19 = sld [smem:[#allocation33_spill]] }
  0xf1   : > { %v2839_v19 = vld [vmem:[%s4086_s9 + $0x30] sm:$0xff]   ;;  %v2841_v21 = vld [vmem:[%s4086_s9 + $0x38] sm:$0xff]   ;;  %v649_v30 = vld [vmem:[%s4084_s7] sm:$0x1]  ;;  %vm1127_vm4 = vcmask 130048   ;;  %s3305_s24 = smov 96  }
  0xf2   : > { %s634_s29 = scalar_lea.vmem %s4144_s27, %s2476_s18  ;;  %2566 = vmatpush3.bf16.msra.mxu0 %v2828_v7  ;;  %2586 = vmatpush3.bf16.msra.mxu1 %v2829_v8  ;;  %v658_v31 = vpack.i.b16 %v649_v30, %v649_v30  ;;  %v2842_v39 = vld [vmem:[%s4087_s10] sm:$0xff]   ;;  %v2843_v41 = vld [vmem:[%s4087_s10 + $0x8] sm:$0xff]   ;;  %v2844_v42 = vld [vmem:[%s4087_s10 + $0x10] sm:$0xff]   ;;  %s3302_s27 = smov 48   ;;  %vm1318_vm6 = vcmask 523520   ;;  %vm1450_vm7 = vcmask 785920  }
  0xf3   : > { %v2481_v1 = vld [vmem:[%s634_s29] sm:$0xff]   ;;  %2567 = vmatprep.subr.bf16.mxu0 %v3298_v0  ;;  %2587 = vmatprep.subr.bf16.mxu1 %v3298_v0  ;;  %v2845_v43 = vld [vmem:[%s4087_s10 + $0x18] sm:$0xff]   ;;  %v2847_v45 = vld [vmem:[%s4087_s10 + $0x28] sm:$0xff]   ;;  %s3303_s29 = smov 112   ;;  %s3306_s3 = smov 32   ;;  %vm1572_vm8 = vcmask 1048320  }
  0xf4   : > { %v3680_v2 = vunpack.c.l.bf16 %v2481_v1  ;;  %v3682_v3 = vunpack.c.h.bf16 %v2481_v1  ;;  %v663_v37 = vrot.slane %v658_v31, %v662_v32  ;;  %v2846_v44 = vld [vmem:[%s4087_s10 + $0x20] sm:$0xff]   ;;  %v2848_v46 = vld [vmem:[%s4087_s10 + $0x30] sm:$0xff]   ;;  %v2849_v47 = vld [vmem:[%s4087_s10 + $0x38] sm:$0xff]   ;;  %s4148_s30 = sld [smem:[#allocation30_spill]]  ;;  %s2479_s20 = sshll.u32 %s3416_s25, 7 }
  0xf5   : > { %v1021_v56 = vld [vmem:[#allocation8] sm:$0xff]  ;;  %v1022_v57 = vld [vmem:[#allocation8 + $0x8] sm:$0xff]  ;;  %v1043_v58 = vld [vmem:[#allocation9] sm:$0xff]  ;;  %s4149_s28 = sld [smem:[#allocation36_spill]] }
  0xf6   : > { %v640_v6 = vmul.f32 %v3680_v2, %v3680_v2  ;;  %v641_v9 = vmul.f32 %v3682_v3, %v3682_v3  ;;  %2568 = vmatpush3.bf16.msra.mxu0 %v2830_v10  ;;  %2588 = vmatpush3.bf16.msra.mxu1 %v2831_v11  ;;  %v1044_v7 = vld [vmem:[#allocation9 + $0x8] sm:$0xff] }
  0xf7   : > { %2569 = vmatprep.subr.bf16.mxu0 %v3298_v0  ;;  %2589 = vmatprep.subr.bf16.mxu1 %v3298_v0  ;;  %v980_v30 = vld [vmem:[%s4145_s19] sm:$0xff] }
  0xf8   : > { %642 = vadd.xlane.f32.xlu0 %v640_v6 }
  0xfa   : > { %2570 = vmatpush3.bf16.msra.mxu0 %v2832_v12  ;;  %2590 = vmatpush3.bf16.msra.mxu1 %v2833_v13  ;;  %p4150_p9 = scmp.ne.s32.totalorder %s4148_s30, 0 }
  0xfb   : > { %2571 = vmatprep.subr.bf16.mxu0 %v3298_v0  ;;  %2591 = vmatprep.subr.bf16.mxu1 %v3298_v0  ;;  %s4030_s13 = scalar_lea.hbm %s4149_s28, %s2479_s20 }
  0xfc   : > { %644 = vadd.xlane.f32.xlu0 %v641_v9 }
  0xfe   : > { %2572 = vmatpush3.bf16.msra.mxu0 %v2834_v14  ;;  %2592 = vmatpush3.bf16.msra.mxu1 %v2835_v15 }
  0xff   : > { %2573 = vmatprep.subr.bf16.mxu0 %v3298_v0  ;;  %2593 = vmatprep.subr.bf16.mxu1 %v3298_v0 }
 0x102   : > { %2574 = vmatpush3.bf16.msra.mxu0 %v2836_v16  ;;  %2594 = vmatpush3.bf16.msra.mxu1 %v2837_v17 }
 0x103   : > { %2575 = vmatprep.subr.bf16.mxu0 %v3298_v0  ;;  %2595 = vmatprep.subr.bf16.mxu1 %v3298_v0 }
 0x106   : > { %2576 = vmatpush3.bf16.msra.mxu0 %v2838_v18  ;;  %2596 = vmatpush3.bf16.msra.mxu1 %v2839_v19 }
 0x107   : > { %2577 = vmatprep.subr.bf16.mxu0 %v3298_v0  ;;  %2597 = vmatprep.subr.bf16.mxu1 %v3298_v0 }
 0x10a   : > { %2578 = vmatpush3.bf16.msra.mxu0 %v2840_v20  ;;  %2598 = vmatpush3.bf16.msra.mxu1 %v2841_v21 }
 0x10b   : > { %2603 = vmatprep.subr.bf16.mxu0 %v3298_v0  ;;  %2623 = vmatprep.subr.bf16.mxu1 %v3298_v0 }
 0x185   : > { %v643_v22 = vpop.xlane.xlu0 %642 }
 0x186   : > { %v647_v23 = vmul.f32 0.0078125, %v643_v22 }
 0x188   : > { %v650_v24 = vadd.f32 1e-05, %v647_v23  ;;  %v1004_v23 = vld [vmem:[#allocation6] sm:$0xff] }
 0x189   : > { %v645_v25 = vpop.xlane.xlu0 %644 }
 0x18a   : > { %v648_v26 = vmul.f32 0.0078125, %v645_v25  ;;  %2922 = vrsqrt.f32 %v650_v24  ;;  %v1005_v24 = vld [vmem:[#allocation6 + $0x8] sm:$0xff] }
 0x18b   : > { %v988_v25 = vld [vmem:[%s4079_s2] sm:$0xff] }
 0x18c   : > { %v651_v27 = vadd.f32 1e-05, %v648_v26 }
 0x18e   : > { %2924 = vrsqrt.f32 %v651_v27 }
 0x194   : > { %v2923_v33 = vpop.eup %2922 }
 0x195   : > { %v654_v35 = vmul.f32 %v2923_v33, %v3680_v2 }
 0x198   : > { %v2925_v34 = vpop.eup %2924 }
 0x199   : > { %v655_v36 = vmul.f32 %v2925_v34, %v3682_v3  ;;  %v989_v34 = vld [vmem:[%s4079_s2 + $0x8] sm:$0xff] }
 0x19b   : > { %v656_v38 = vpack.c.bf16 %v655_v36, %v654_v35  ;;  %v998_v35 = vld [vmem:[#allocation3] sm:$0xff] }
 0x19d   : > { %v664_v40 = vmul.bf16 %v663_v37, %v656_v38 }
 0x19f   : > { %2580 = vmatmul.mubr.bf16.vlgmr.msra.gmra.mrb[0].mxu0 %v664_v40  ;;  %2600 = vmatmul.mubr.bf16.vlgmr.msra.gmra.mrb[0].mxu1 %v664_v40 }
 0x1a0   : > { %2604 = vmatpush3.bf16.msra.mxu0 %v2842_v39  ;;  %2619 = vmatprep.mubr.msk.bf16.mxu0 %vm3299_vm0, %v3298_v0 }
 0x1a1   : > { %2605 = vmatprep.subr.bf16.mxu0 %v3298_v0  ;;  %2625 = vmatprep.mubr.msk.bf16.mxu1 %vm3299_vm0, %v3298_v0 }
 0x1a4   : > { %2606 = vmatpush3.bf16.msra.mxu0 %v2843_v41 }
 0x1a5   : > { %2607 = vmatprep.subr.bf16.mxu0 %v3298_v0 }
 0x1a8   : > { %2608 = vmatpush3.bf16.msra.mxu0 %v2844_v42 }
 0x1a9   : > { %2609 = vmatprep.subr.bf16.mxu0 %v3298_v0 }
 0x1ac   : > { %2610 = vmatpush3.bf16.msra.mxu0 %v2845_v43 }
 0x1ad   : > { %2611 = vmatprep.subr.bf16.mxu0 %v3298_v0 }
 0x1b0   : > { %2612 = vmatpush3.bf16.msra.mxu0 %v2846_v44 }
 0x1b1   : > { %2613 = vmatprep.subr.bf16.mxu0 %v3298_v0 }
 0x1b4   : > { %2614 = vmatpush3.bf16.msra.mxu0 %v2847_v45 }
 0x1b5   : > { %2615 = vmatprep.subr.bf16.mxu0 %v3298_v0 }
 0x1b8   : > { %2616 = vmatpush3.bf16.msra.mxu0 %v2848_v46 }
 0x1b9   : > { %2617 = vmatprep.subr.bf16.mxu0 %v3298_v0 }
 0x1bc   : > { %2618 = vmatpush3.bf16.msra.mxu0 %v2849_v47  ;;  %v999_v47 = vld [vmem:[#allocation3 + $0x8] sm:$0xff] }
 0x1bd   : > { %2647 = vmatprep.subr.bf16.mxu0 %v3298_v0 }
 0x1bf   : > { %2620 = vmatmul.mubr.bf16.vlgmr.msra.gmra.mrb[4].mxu0 %v664_v40  ;;  %v981_v40 = vld [vmem:[%s4145_s19 + $0x8] sm:$0xff] }
 0x1c0   : > { %2649 = vmatprep.mubr.msk.bf16.mxu0 %vm3299_vm0, %v3298_v0 }
 0x272   : > { %v3805_v48 = vpop.f32.mrb[0].mxu0  ;;  %v3807_v49 = vpop.f32.mrb[0].mxu1 }
 0x273   : > { %1009 = vrot.lane.b32.xlu1 %v3807_v49, %s3300_s26  ;;  %v2581_v50 = vpop.f32.mrb[1].mxu0  ;;  %v2601_v51 = vpop.f32.mrb[1].mxu1  ;;  %v1006_v31 = vmul.f32 %v1004_v23, %v3807_v49  ;;  %v982_v39 = vmul.f32 %v980_v30, %v3805_v48 }
 0x274   : > { %v3811_v52 = vpop.f32.mrb[2].mxu0  ;;  %v871_v53 = vpop.f32.mrb[2].mxu1 }
 0x275   : > { %v2582_v54 = vpop.f32.mrb[3].mxu0  ;;  %v2602_v55 = vpop.f32.mrb[3].mxu1  ;;  %v1007_v33 = vmul.f32 %v1005_v24, %v871_v53 }
 0x277   : > { %1012 = vrot.lane.b32.xlu1 %v871_v53, %s3300_s26 }
 0x27b   : > { %1025 = vrot.lane.b32.xlu1 %v1021_v56, %s3301_s0 }
 0x27f   : > { %1027 = vrot.lane.b32.xlu1 %v1022_v57, %s3301_s0 }
 0x283   : > { %1047 = vrot.lane.b32.xlu1 %v1043_v58, %s3302_s27 }
 0x292   : > { %v973_v59 = vpop.f32.mrb[4].mxu0 }
 0x293   : > { %v2621_v60 = vpop.f32.mrb[5].mxu0 }
 0x294   : > { %v976_v61 = vpop.f32.mrb[6].mxu0 }
 0x295   : > { %v3816_v62 = vpack.c.bf16 %v976_v61, %v973_v59  ;;  %v2622_v63 = vpop.f32.mrb[7].mxu0  ;;  %v3858_v61 = vadd.s32 8, %v3757_v29 }
 0x2e5   : > { %v1010_v1 = vpop.permute.xlu1 %1009 }
 0x2e6   : > { %v1011_v4 = vsel %vm1008_vm1, %v1010_v1, %v3807_v49 }
 0x2e7   : > { %1015 = vrot.lane.b32.xlu0 %v1011_v4, %s3300_s26 }
 0x2e9   : > { %v1013_v5 = vpop.permute.xlu1 %1012 }
 0x2ea   : > { %v1014_v6 = vsel %vm1008_vm1, %v1013_v5, %v871_v53 }
 0x2eb   : > { %1017 = vrot.lane.b32.xlu1 %v1014_v6, %s3300_s26  ;;  %986 = vrot.lane.b32.xlu0 %v3811_v52, %s3303_s29 }
 0x2ed   : > { %v1026_v8 = vpop.permute.xlu1 %1025 }
 0x2ef   : > { %1049 = vrot.lane.b32.xlu1 %v1044_v7, %s3302_s27  ;;  %s4147_s27 = sld [smem:[#allocation25_spill]] }
 0x2f1   : > { %v1028_v9 = vpop.permute.xlu1 %1027 }
 0x2f3   : > { %984 = vrot.lane.b32.xlu1 %v3805_v48, %s3303_s29 }
 0x2f5   : > { %v1048_v10 = vpop.permute.xlu1 %1047 }
 0x359   : > { %v1016_v11 = vpop.permute.xlu0 %1015 }
 0x35a   : > { %v1019_v12 = vsel %vm1008_vm1, %v1016_v11, %v3807_v49  ;;  %v983_v49 = vmul.f32 %v981_v40, %v3811_v52 }
 0x35b   : > { %v1031_v13 = vmul.f32 %v1026_v8, %v1019_v12  ;;  %v1053_v16 = vmul.f32 %v1048_v10, %v1019_v12 }
 0x35d   : > { %v1018_v14 = vpop.permute.xlu1 %1017  ;;  %1035 = vrot.lane.b32.xlu1 %v1031_v13, %s3303_s29  ;;  %v987_v21 = vpop.permute.xlu0 %986 }
 0x35e   : > { %v1020_v15 = vsel %vm1008_vm1, %v1018_v14, %v871_v53  ;;  %v991_v43 = vmul.f32 %v989_v34, %v987_v21 }
 0x35f   : > { %v1032_v17 = vmul.f32 %v1028_v9, %v1020_v15 }
 0x360   : > { %v993_v54 = vadd.f32 %v991_v43, %v983_v49 }
 0x361   : > { %v1050_v18 = vpop.permute.xlu1 %1049  ;;  %1057 = vrot.lane.b32.xlu1 %v1053_v16, %s3304_s21  ;;  %1037 = vrot.lane.b32.xlu0 %v1032_v17, %s3303_s29  ;;  %s627_s29 = sand.u32 1, %s4147_s27  }
 0x362   : > { %v1054_v19 = vmul.f32 %v1050_v18, %v1020_v15 }
 0x365   : > { %994 = vrot.lane.b32.xlu1 %v3805_v48, %s3301_s0  ;;  %1059 = vrot.lane.b32.xlu0 %v1054_v19, %s3304_s21  ;;  %v985_v20 = vpop.permute.xlu1 %984  ;;  %s2374_s21 = sshll.u32 %s627_s29, 3 }
 0x366   : > { %v990_v36 = vmul.f32 %v988_v25, %v985_v20  ;;  %s629_s1 = scalar_lea.vmem [#allocation17], %s2374_s21 }
 0x367   : > { %s2213_s23 = sshll.u32 %s629_s1, 4  ;;  %s4032_s23 = int_to_ptr.vmem [resolvable:$true] %s2213_s23 }
 0x368   : > { %v992_v50 = vadd.f32 %v990_v36, %v982_v39  ;;  %s3202_s25 = scalar_lea.vmem %s4032_s23, 128 }
 0x369   : > { %996 = vrot.lane.b32.xlu0 %v3811_v52, %s3301_s0  ;;  %v3855_v52 = vand.u32 127, %v660_v28  ;;  %s4146_s0 = sld [smem:[#allocation35_spill]]  ;;  %p3203_p6 = scmp.ne.s32.totalorder %s4032_s23, %s3202_s25 }
 0x36b   : > { %vm1075_vm3 = vcmp.le.s32.totalorder %v3855_v52, %v3757_v29  ;;  %vm1076_vm5 = vcmp.le.s32.totalorder %v3855_v52, %v3858_v61  ;;  %v2914_v29 = vld [vmem:[#allocation15 + $0x60] sm:$0xff]   ;;  %p3204_p5 = pnand %p3203_p6, %p4150_p9 }
 0x36d   : > { %p3205_p0 = pneg %p3204_p5 }
 0x3cf   : > { %v1036_v22 = vpop.permute.xlu1 %1035 }
 0x3d0   : > { %v1041_v37 = vadd.f32 %v1036_v22, %v1006_v31 }
 0x3d3   : > { %v1058_v26 = vpop.permute.xlu1 %1057  ;;  %v1038_v27 = vpop.permute.xlu0 %1037 }
 0x3d4   : > { %v1042_v38 = vadd.f32 %v1038_v27, %v1007_v33  ;;  %v1063_v44 = vadd.f32 %v1058_v26, %v1041_v37 }
 0x3d7   : > { %v995_v41 = vpop.permute.xlu1 %994  ;;  %v1060_v42 = vpop.permute.xlu0 %1059 }
 0x3d8   : > { %v1000_v45 = vmul.f32 %v998_v35, %v995_v41  ;;  %v1064_v46 = vadd.f32 %v1060_v42, %v1042_v38 }
 0x3da   : > { %v1068_v51 = vpack.c.bf16 %v1064_v46, %v1063_v44  ;;  %v1002_v55 = vadd.f32 %v1000_v45, %v992_v50 }
 0x3db   : > { %v997_v53 = vpop.permute.xlu0 %996 }
 0x3dc   : > { %v1001_v48 = vmul.f32 %v999_v47, %v997_v53  ;;  %v1082_v56 = vsel %vm1077_vm2, %v1068_v51, 0  ;;  %v1065_v58 = vmul.f32 0.17677669, %v1002_v55 }
 0x3dd   : > { %2624 = vmatpush3.bf16.xpose.msra.mxu1 %v1082_v56 }
 0x3de   : > { %v1003_v57 = vadd.f32 %v1001_v48, %v993_v54  ;;  %2629 = vmatprep.subr.bf16.mxu1 %v3298_v0 }
 0x3e0   : > { %v1066_v59 = vmul.f32 0.17677669, %v1003_v57 }
 0x3e2   : > { %v1067_v60 = vpack.c.bf16 %v1066_v59, %v1065_v58 }
 0x3e4   : > { %2626 = vmatmul.mubr.msk.bf16.vlgmr.msra.gmra.mrb[4].mxu1 %vm1077_vm2, %v1067_v60 }
 0x3e5   : > { %2630 = vmatpush3.bf16.msra.mxu1 %v3816_v62  ;;  %2631 = vmatprep.mubr.msk.bf16.mxu1 %vm3299_vm0, %v3298_v0 }
 0x3e6   : > { %2635 = vmatprep.subr.bf16.mxu1 %v3298_v0 }
 0x4b7   : > { %v1118_v63 = vpop.f32.mrb[4].mxu1 }
 0x4b8   : > { %v1125_v1 = vsel %vm1075_vm3, %v1118_v63, -1e+30  ;;  %v2627_v4 = vpop.f32.mrb[5].mxu1 }
 0x4b9   : > { %v1121_v5 = vpop.f32.mrb[6].mxu1  ;;  %v1128_v28 = vsel %vm1127_vm4, %v1125_v1, -inf }
 0x4ba   : > { %v1126_v6 = vsel %vm1076_vm5, %v1121_v5, -1e+30  ;;  %1129 = vmax.xlane.f32.xlu1 %v1128_v28  ;;  %v2628_v7 = vpop.f32.mrb[7].mxu1 }
 0x4bb   : > { %v1131_v8 = vsel %vm1127_vm4, %v1126_v6, -inf }
 0x4bc   : > { %1132 = vmax.xlane.f32.xlu0 %v1131_v8 }
 0x4cb   : > { %1323 = vrot.lane.b32.xlu1 %v1068_v51, %s3305_s24 }
 0x4cf   : > { %1320 = vrot.lane.b32.xlu1 %v1067_v60, %s3300_s26 }
 0x4d2   : > { %1198 = vrot.lane.b32.xlu0 %v1067_v60, %s3305_s24 }
 0x4d6   : > { %1452 = vrot.lane.b32.xlu0 %v1067_v60, %s3306_s3 }
 0x547   : > { %v1130_v9 = vpop.xlane.xlu1 %1129 }
 0x548   : > { %v1134_v10 = vsub.f32 %v1125_v1, %v1130_v9 }
 0x549   : > { %v1133_v11 = vpop.xlane.xlu0 %1132 }
 0x54a   : > { %v1136_v12 = vmul.f32 1.442695, %v1134_v10  ;;  %v1135_v13 = vsub.f32 %v1126_v6, %v1133_v11 }
 0x54b   : > { %v1324_v14 = vpop.permute.xlu1 %1323 }
 0x54c   : > { %v1138_v15 = vmul.f32 1.442695, %v1135_v13  ;;  %v1329_v16 = vsel %vm1077_vm2, %v1324_v14, 0  ;;  %2926 = vpow2.f32 %v1136_v12 }
 0x54d   : > { %2648 = vmatpush3.bf16.xpose.msra.mxu0 %v1329_v16  ;;  %v1199_v18 = vpop.permute.xlu0 %1198 }
 0x54e   : > { %2928 = vpow2.f32 %v1138_v15  ;;  %2659 = vmatprep.subr.bf16.mxu0 %v3298_v0 }
 0x54f   : > { %v1321_v17 = vpop.permute.xlu1 %1320 }
 0x551   : > { %v1453_v22 = vpop.permute.xlu0 %1452 }
 0x554   : > { %2650 = vmatmul.mubr.msk.bf16.vlgmr.msra.gmra.mrb[8].mxu0 %vm1077_vm2, %v1321_v17 }
 0x555   : > { %2660 = vmatpush3.bf16.xpose.msra.mxu0 %v1329_v16  ;;  %2661 = vmatprep.mubr.msk.bf16.mxu0 %vm3299_vm0, %v3298_v0 }
 0x556   : > { %2671 = vmatprep.subr.bf16.mxu0 %v3298_v0  ;;  %v3882_v19 = vpop.eup %2926 }
 0x558   : > { %v3884_v20 = vpop.eup %2928 }
 0x559   : > { %v1146_v21 = vpack.c.bf16 %v3884_v20, %v3882_v19 }
 0x55b   : > { %2632 = vmatmul.mubr.msk.bf16.vlgmr.msra.gmra.mrb[8].mxu1 %vm1127_vm4, %v1146_v21 }
 0x55c   : > { %2636 = vmatpush3.bf16.xpose.msra.mxu1 %v1082_v56  ;;  %2662 = vmatmul.mubr.msk.bf16.vlgmr.msra.gmra.mrb[12].mxu0 %vm1077_vm2, %v1453_v22 }
 0x55d   : > { %2637 = vmatprep.mubr.msk.bf16.mxu1 %vm3299_vm0, %v3298_v0  ;;  %2641 = vmatprep.subr.bf16.mxu1 %v3298_v0 }
 0x55e   : > { %2687 = vmatprep.mubr.msk.bf16.mxu0 %vm3299_vm0, %v3298_v0 }
 0x563   : > { %2638 = vmatmul.mubr.msk.bf16.vlgmr.msra.gmra.mrb[12].mxu1 %vm1077_vm2, %v1199_v18 }
 0x564   : > { %2642 = vmatpush3.bf16.msra.mxu1 %v3816_v62  ;;  %2643 = vmatprep.mubr.msk.bf16.mxu1 %vm3299_vm0, %v3298_v0 }
 0x565   : > { %2653 = vmatprep.subr.bf16.mxu1 %v3298_v0 }
 0x627   : > { %v1365_v23 = vpop.f32.mrb[8].mxu0 }
 0x628   : > { %v2651_v24 = vpop.f32.mrb[9].mxu0  ;;  %v1372_v47 = vsel %vm1075_vm3, %v1365_v23, -1e+30 }
 0x629   : > { %v1368_v25 = vpop.f32.mrb[10].mxu0  ;;  %v1374_v51 = vsel %vm1127_vm4, %v1372_v47, -inf }
 0x62a   : > { %v2652_v26 = vpop.f32.mrb[11].mxu0  ;;  %v1373_v43 = vsel %vm1076_vm5, %v1368_v25, -1e+30 }
 0x62b   : > { %v1377_v49 = vsel %vm1127_vm4, %v1373_v43, -inf }
 0x62e   : > { %v3900_v27 = vpop.f32.mrb[8].mxu1 }
 0x62f   : > { %v2633_v30 = vpop.f32.mrb[9].mxu1  ;;  %v1491_v31 = vpop.f32.mrb[12].mxu0 }
 0x630   : > { %v3902_v33 = vpop.f32.mrb[10].mxu1  ;;  %v2663_v34 = vpop.f32.mrb[13].mxu0  ;;  %v1498_v53 = vsel %vm1075_vm3, %v1491_v31, -1e+30  ;;  %v1140_v31 = vsel %vm1127_vm4, %v3882_v19, 0.0 }
 0x631   : > { %v2634_v35 = vpop.f32.mrb[11].mxu1  ;;  %v1494_v36 = vpop.f32.mrb[14].mxu0  ;;  %v1500_v55 = vsel %vm1127_vm4, %v1498_v53, -inf  ;;  %v1143_v34 = vsel %vm1127_vm4, %v3884_v20, 0.0 }
 0x632   : > { %v2664_v37 = vpop.f32.mrb[15].mxu0  ;;  %v1499_v50 = vsel %vm1076_vm5, %v1494_v36, -1e+30  ;;  %v2850_v35 = vld [vmem:[#allocation11] sm:$0xff]   ;;  %v2851_v36 = vld [vmem:[#allocation11 + $0x8] sm:$0xff]  }
 0x633   : > { %v1503_v54 = vsel %vm1127_vm4, %v1499_v50, -inf  ;;  %2672 = vmatpush3.bf16.msra.mxu0 %v2850_v35  ;;  %v2872_v35 = vld [vmem:[%s4146_s0 + $0x24] ss:$8 sps:$4 sm:$0xff]  }
 0x634   : > { %2673 = vmatprep.subr.bf16.mxu0 %v3298_v0 }
 0x636   : > { %v1237_v38 = vpop.f32.mrb[12].mxu1 }
 0x637   : > { %v1244_v39 = vsel %vm1075_vm3, %v1237_v38, -1e+30  ;;  %v2639_v40 = vpop.f32.mrb[13].mxu1  ;;  %2674 = vmatpush3.bf16.msra.mxu0 %v2851_v36  ;;  %v2875_v36 = vld [vmem:[#allocation14 + $0x24] ss:$8 sps:$4 sm:$0xff]  }
 0x638   : > { %v1240_v41 = vpop.f32.mrb[14].mxu1  ;;  %v1246_v42 = vsel %vm1127_vm4, %v1244_v39, -inf  ;;  %2675 = vmatprep.subr.bf16.mxu0 %v3298_v0 }
 0x639   : > { %v1245_v44 = vsel %vm1076_vm5, %v1240_v41, -1e+30  ;;  %1247 = vmax.xlane.f32.xlu1 %v1246_v42  ;;  %v2640_v45 = vpop.f32.mrb[15].mxu1 }
 0x63a   : > { %v1249_v46 = vsel %vm1127_vm4, %v1245_v44, -inf }
 0x63b   : > { %1250 = vmax.xlane.f32.xlu0 %v1249_v46 }
 0x63d   : > { %1378 = vmax.xlane.f32.xlu1 %v1377_v49  ;;  %v2853_v49 = vld [vmem:[#allocation11 + $0x18] sm:$0xff]  }
 0x63f   : > { %1375 = vmax.xlane.f32.xlu0 %v1374_v51 }
 0x641   : > { %1504 = vmax.xlane.f32.xlu1 %v1503_v54  ;;  %v2854_v54 = vld [vmem:[#allocation11 + $0x20] sm:$0xff]  }
 0x643   : > { %1501 = vmax.xlane.f32.xlu0 %v1500_v55 }
 0x659   : > { %1394 = vrot.lane.b32.xlu0 %v3816_v62, %s3305_s24 }
 0x6c6   : > { %v1248_v48 = vpop.xlane.xlu1 %1247 }
 0x6c7   : > { %v1252_v56 = vsub.f32 %v1244_v39, %v1248_v48 }
 0x6c8   : > { %v1251_v57 = vpop.xlane.xlu0 %1250 }
 0x6c9   : > { %v1254_v58 = vmul.f32 1.442695, %v1252_v56  ;;  %v1253_v59 = vsub.f32 %v1245_v44, %v1251_v57 }
 0x6ca   : > { %v1379_v60 = vpop.xlane.xlu1 %1378 }
 0x6cb   : > { %v1256_v61 = vmul.f32 1.442695, %v1253_v59  ;;  %v1381_v63 = vsub.f32 %v1373_v43, %v1379_v60  ;;  %2930 = vpow2.f32 %v1254_v58  ;;  %v2855_v58 = vld [vmem:[#allocation11 + $0x28] sm:$0xff]  }
 0x6cc   : > { %v1376_v52 = vpop.xlane.xlu0 %1375 }
 0x6cd   : > { %2932 = vpow2.f32 %v1256_v61  ;;  %v1380_v1 = vsub.f32 %v1372_v47, %v1376_v52  ;;  %v1384_v4 = vmul.f32 1.442695, %v1381_v63  ;;  %v2852_v47 = vld [vmem:[#allocation11 + $0x10] sm:$0xff]  }
 0x6ce   : > { %v1505_v5 = vpop.xlane.xlu1 %1504  ;;  %2676 = vmatpush3.bf16.msra.mxu0 %v2852_v47  ;;  %v2882_v47 = vld [vmem:[%s4146_s0 + $0x40] ss:$8 sps:$4 sm:$0xff]  }
 0x6cf   : > { %v1382_v28 = vmul.f32 1.442695, %v1380_v1  ;;  %v1507_v6 = vsub.f32 %v1499_v50, %v1505_v5  ;;  %2677 = vmatprep.subr.bf16.mxu0 %v3298_v0  ;;  %v2856_v5 = vld [vmem:[#allocation11 + $0x30] sm:$0xff]  }
 0x6d0   : > { %v1502_v7 = vpop.xlane.xlu0 %1501 }
 0x6d1   : > { %2934 = vpow2.f32 %v1382_v28  ;;  %v1510_v8 = vmul.f32 1.442695, %v1507_v6  ;;  %v1506_v62 = vsub.f32 %v1498_v53, %v1502_v7  ;;  %v2857_v7 = vld [vmem:[#allocation11 + $0x38] sm:$0xff]  }
 0x6d2   : > { %2936 = vpow2.f32 %v1384_v4  ;;  %2678 = vmatpush3.bf16.msra.mxu0 %v2853_v49  ;;  %v2884_v49 = vld [vmem:[%s4146_s0 + $0x44] ss:$8 sps:$4 sm:$0xff]  }
 0x6d3   : > { %2938 = vpow2.f32 %v1510_v8  ;;  %v1508_v11 = vmul.f32 1.442695, %v1506_v62  ;;  %2679 = vmatprep.subr.bf16.mxu0 %v3298_v0 }
 0x6d4   : > { %v1395_v13 = vpop.permute.xlu0 %1394 }
 0x6d5   : > { %v2931_v9 = vpop.eup %2930  ;;  %2940 = vpow2.f32 %v1508_v11 }
 0x6d6   : > { %v1258_v23 = vsel %vm1127_vm4, %v2931_v9, 0.0  ;;  %2680 = vmatpush3.bf16.msra.mxu0 %v2854_v54  ;;  %v2891_v54 = vld [vmem:[#allocation14 + $0x50] ss:$8 sps:$4 sm:$0xff]  }
 0x6d7   : > { %v2933_v10 = vpop.eup %2932  ;;  %2681 = vmatprep.subr.bf16.mxu0 %v3298_v0 }
 0x6d8   : > { %v1264_v12 = vpack.c.bf16 %v2933_v10, %v2931_v9  ;;  %v1261_v25 = vsel %vm1127_vm4, %v2933_v10, 0.0 }
 0x6da   : > { %2644 = vmatmul.mubr.msk.bf16.vlgmr.msra.gmra.mrb[16].mxu1 %vm1127_vm4, %v1264_v12  ;;  %2682 = vmatpush3.bf16.msra.mxu0 %v2855_v58  ;;  %v2897_v58 = vld [vmem:[#allocation14 + $0x60] ss:$8 sps:$4 sm:$0xff]  }
 0x6db   : > { %v2935_v14 = vpop.eup %2934  ;;  %2654 = vmatpush3.bf16.msra.mxu1 %v1395_v13  ;;  %2655 = vmatprep.mubr.msk.bf16.mxu1 %vm3299_vm0, %v3298_v0 }
 0x6dc   : > { %v2937_v15 = vpop.eup %2936  ;;  %v1386_v16 = vsel %vm1127_vm4, %v2935_v14, 0.0  ;;  %2665 = vmatprep.subr.bf16.mxu1 %v3298_v0  ;;  %2683 = vmatprep.subr.bf16.mxu0 %v3298_v0 }
 0x6dd   : > { %v2939_v17 = vpop.eup %2938  ;;  %1387 = vadd.xlane.f32.xlu1 %v1386_v16  ;;  %v1389_v21 = vsel %vm1127_vm4, %v2937_v15, 0.0  ;;  %v1392_v22 = vpack.c.bf16 %v2937_v15, %v2935_v14 }
 0x6de   : > { %v1515_v18 = vsel %vm1127_vm4, %v2939_v17, 0.0  ;;  %2684 = vmatpush3.bf16.msra.mxu0 %v2856_v5 }
 0x6df   : > { %1516 = vadd.xlane.f32.xlu0 %v1515_v18  ;;  %v2941_v24 = vpop.eup %2940  ;;  %2685 = vmatprep.subr.bf16.mxu0 %v3298_v0 }
 0x6e0   : > { %v1518_v26 = vpack.c.bf16 %v2939_v17, %v2941_v24  ;;  %v1512_v30 = vsel %vm1127_vm4, %v2941_v24, 0.0  ;;  %v2861_v24 = vld [vmem:[#allocation14] ss:$8 sps:$4 sm:$0xff]  }
 0x6e1   : > { %1390 = vadd.xlane.f32.xlu1 %v1389_v21 }
 0x6e2   : > { %2656 = vmatmul.mubr.msk.bf16.vlgmr.msra.gmra.mrb[20].mxu1 %vm1127_vm4, %v1392_v22  ;;  %2686 = vmatpush3.bf16.msra.mxu0 %v2857_v7  ;;  %v2858_v22 = vld [vmem:[%s4146_s0] ss:$8 sps:$4 sm:$0xff]  }
 0x6e3   : > { %2666 = vmatpush3.bf16.msra.mxu1 %v1395_v13  ;;  %2667 = vmatprep.mubr.msk.bf16.mxu1 %vm3299_vm0, %v3298_v0  ;;  %v1690_v7 = vld [vmem:[#allocation12] sm:$0x1] }
 0x6e5   : > { %1259 = vadd.xlane.f32.xlu1 %v1258_v23  ;;  %v2860_v23 = vld [vmem:[%s4146_s0 + $0x4] ss:$8 sps:$4 sm:$0xff]  }
 0x6e6   : > { %1802 = vmatprep.subr.bf16.mxu1 %v2860_v23  ;;  %v2913_v23 = vld [vmem:[#allocation15 + $0x18] sm:$0xff]  }
 0x6e9   : > { %1262 = vadd.xlane.f32.xlu1 %v1261_v25  ;;  %v2863_v25 = vld [vmem:[#allocation14 + $0x4] ss:$8 sps:$4 sm:$0xff]  }
 0x6ea   : > { %2668 = vmatmul.mubr.msk.bf16.vlgmr.msra.gmra.mrb[24].mxu1 %vm1127_vm4, %v1518_v26  ;;  %v2866_v26 = vld [vmem:[%s4146_s0 + $0x14] ss:$8 sps:$4 sm:$0xff]   ;;  %1941 = vmatprep.subr.bf16.mxu0 %v2863_v25 }
 0x6eb   : > { %1803 = vmatpush1.bf16.msra.mxu1 %v2858_v22  ;;  %v2912_v22 = vld [vmem:[#allocation15 + $0x58] sm:$0xff]   ;;  %v2917_v25 = vld [vmem:[#allocation15 + $0x28] sm:$0xff]  }
 0x6ec   : > { %1804 = vmatprep.subr.bf16.mxu1 %v2866_v26  ;;  %v2918_v26 = vld [vmem:[#allocation15 + $0x70] sm:$0xff]  }
 0x6ed   : > { %1513 = vadd.xlane.f32.xlu1 %v1512_v30  ;;  %v2869_v30 = vld [vmem:[#allocation14 + $0x14] ss:$8 sps:$4 sm:$0xff]  }
 0x6f1   : > { %1141 = vadd.xlane.f32.xlu1 %v1140_v31  ;;  %v2864_v31 = vld [vmem:[%s4146_s0 + $0x10] ss:$8 sps:$4 sm:$0xff]  }
 0x6f2   : > { %1805 = vmatpush1.bf16.msra.mxu1 %v2864_v31  ;;  %v2920_v31 = vld [vmem:[#allocation15 + $0x78] sm:$0xff]  }
 0x6f3   : > { %1806 = vmatprep.subr.bf16.mxu1 %v2872_v35 }
 0x6f5   : > { %1144 = vadd.xlane.f32.xlu1 %v1143_v34  ;;  %v2867_v34 = vld [vmem:[#allocation14 + $0x10] ss:$8 sps:$4 sm:$0xff]  }
 0x76a   : > { %v1388_v37 = vpop.xlane.xlu1 %1387 }
 0x76c   : > { %v1517_v57 = vpop.xlane.xlu0 %1516 }
 0x76e   : > { %v1391_v38 = vpop.xlane.xlu1 %1390 }
 0x772   : > { %v1260_v39 = vpop.xlane.xlu1 %1259 }
 0x776   : > { %v1263_v40 = vpop.xlane.xlu1 %1262 }
 0x77a   : > { %v1514_v41 = vpop.xlane.xlu1 %1513 }
 0x77e   : > { %v1142_v42 = vpop.xlane.xlu1 %1141 }
 0x77f   : > { %2942 = vrcp.f32 %v1142_v42 }
 0x782   : > { %v1145_v19 = vpop.xlane.xlu1 %1144 }
 0x783   : > { %2944 = vrcp.f32 %v1145_v19 }
 0x784   : > { %2946 = vrcp.f32 %v1260_v39 }
 0x785   : > { %2948 = vrcp.f32 %v1263_v40 }
 0x786   : > { %2950 = vrcp.f32 %v1388_v37  ;;  %v2870_v37 = vld [vmem:[%s4146_s0 + $0x20] ss:$8 sps:$4 sm:$0xff]  }
 0x787   : > { %2952 = vrcp.f32 %v1391_v38  ;;  %v2873_v38 = vld [vmem:[#allocation14 + $0x20] ss:$8 sps:$4 sm:$0xff]   ;;  %1807 = vmatpush1.bf16.msra.mxu1 %v2870_v37 }
 0x788   : > { %2954 = vrcp.f32 %v1517_v57  ;;  %v2894_v57 = vld [vmem:[%s4146_s0 + $0x60] ss:$8 sps:$4 sm:$0xff]  }
 0x789   : > { %v2943_v43 = vpop.eup %2942  ;;  %2956 = vrcp.f32 %v1514_v41 }
 0x78a   : > { %v1193_v44 = vmul.f32 %v2943_v43, %v3900_v27 }
 0x78d   : > { %v2945_v20 = vpop.eup %2944 }
 0x78e   : > { %v1194_v45 = vmul.f32 %v2945_v20, %v3902_v33  ;;  %v2947_v51 = vpop.eup %2946 }
 0x78f   : > { %v2949_v27 = vpop.eup %2948 }
 0x790   : > { %v1195_v46 = vpack.c.bf16 %v1194_v45, %v1193_v44  ;;  %v2951_v60 = vpop.eup %2950  ;;  %v2878_v45 = vld [vmem:[%s4146_s0 + $0x34] ss:$8 sps:$4 sm:$0xff]  }
 0x791   : > { %v2953_v1 = vpop.eup %2952  ;;  %1808 = vmatprep.subr.bf16.mxu1 %v2878_v45 }
 0x792   : > { %1196 = vst.msk [vmem:[#allocation2] sm:$0xff] %vm1077_vm2, %v1195_v46  ;;  %v2955_v9 = vpop.eup %2954  ;;  %v2876_v46 = vld [vmem:[%s4146_s0 + $0x30] ss:$8 sps:$4 sm:$0xff]  }
 0x793   : > { %v2957_v11 = vpop.eup %2956  ;;  %1809 = vmatpush1.bf16.msra.mxu1 %v2876_v46 }
 0x794   : > { %1810 = vmatprep.subr.bf16.mxu1 %v2884_v49 }
 0x797   : > { %1811 = vmatpush1.bf16.msra.mxu1 %v2882_v47 }
 0x7ad   : > { %v1302_v50 = vpop.f32.mrb[16].mxu1 }
 0x7ae   : > { %v2645_v53 = vpop.f32.mrb[17].mxu1  ;;  %v1311_v55 = vmul.f32 %v2947_v51, %v1302_v50  ;;  %v2885_v50 = vld [vmem:[#allocation14 + $0x40] ss:$8 sps:$4 sm:$0xff]   ;;  %v2887_v51 = vld [vmem:[#allocation14 + $0x44] ss:$8 sps:$4 sm:$0xff]  }
 0x7af   : > { %v1305_v33 = vpop.f32.mrb[18].mxu1  ;;  %v2890_v53 = vld [vmem:[%s4146_s0 + $0x54] ss:$8 sps:$4 sm:$0xff]  }
 0x7b0   : > { %v1312_v48 = vmul.f32 %v2949_v27, %v1305_v33  ;;  %v2646_v56 = vpop.f32.mrb[19].mxu1  ;;  %v2893_v27 = vld [vmem:[#allocation14 + $0x54] ss:$8 sps:$4 sm:$0xff]   ;;  %v2888_v33 = vld [vmem:[%s4146_s0 + $0x50] ss:$8 sps:$4 sm:$0xff]   ;;  %1812 = vmatprep.subr.bf16.mxu1 %v2890_v53 }
 0x7b1   : > { %v3307_v56 = vmov 0   ;;  %1813 = vmatpush1.bf16.msra.mxu1 %v2888_v33 }
 0x7b2   : > { %v1313_v59 = vpack.c.bf16 %v1312_v48, %v1311_v55  ;;  %v2896_v55 = vld [vmem:[%s4146_s0 + $0x64] ss:$8 sps:$4 sm:$0xff]   ;;  %1834 = vmatprep.mubr.bf16.mxu1 %v3307_v56 }
 0x7b3   : > { %v2899_v48 = vld [vmem:[#allocation14 + $0x64] ss:$8 sps:$4 sm:$0xff]   ;;  %1814 = vmatprep.subr.bf16.mxu1 %v2896_v55 }
 0x7b4   : > { %1315 = vrot.lane.b32.xlu1 %v1313_v59, %s3306_s3  ;;  %v2902_v59 = vld [vmem:[%s4146_s0 + $0x74] ss:$8 sps:$4 sm:$0xff]   ;;  %s3308_s3 = smov [#allocation17]  }
 0x7b5   : > { %v1434_v61 = vpop.f32.mrb[20].mxu1  ;;  %1815 = vmatpush1.bf16.msra.mxu1 %v2894_v57  ;;  %s3206_s16 = sshll.u32 %s3308_s3, 4  ;;  %s3207_s16 = int_to_ptr.vmem [resolvable:$false] %s3206_s16 }
 0x7b6   : > { %v1443_v63 = vmul.f32 %v2951_v60, %v1434_v61  ;;  %v2657_v52 = vpop.f32.mrb[21].mxu1  ;;  %v2905_v60 = vld [vmem:[#allocation14 + $0x74] ss:$8 sps:$4 sm:$0xff]   ;;  %v2900_v61 = vld [vmem:[%s4146_s0 + $0x70] ss:$8 sps:$4 sm:$0xff]   ;;  %1816 = vmatprep.subr.bf16.mxu1 %v2902_v59  ;;  %s3208_s18 = scalar_lea.vmem %s3207_s16, 256  ;;  %p3209_p10 = scmp.lt.s32.totalorder %s4032_s23, %s3207_s16 }
 0x7b7   : > { %v1437_v4 = vpop.f32.mrb[22].mxu1  ;;  %p3210_p2 = scmp.lt.s32.totalorder %s3208_s18, %s3202_s25 }
 0x7b8   : > { %v1444_v28 = vmul.f32 %v2953_v1, %v1437_v4  ;;  %v2658_v6 = vpop.f32.mrb[23].mxu1 }
 0x7b9   : > { %1817 = vmatpush1.bf16.msra.mxu1 %v2900_v61  ;;  %p3211_p3 = por %p3210_p2, %p3209_p10 }
 0x7ba   : > { %v1445_v8 = vpack.c.bf16 %v1444_v28, %v1443_v63  ;;  %v2903_v63 = vld [vmem:[#allocation14 + $0x70] ss:$8 sps:$4 sm:$0xff]  }
 0x7bb   : > { %p3212_p4 = pnand %p3211_p3, %p3205_p0 }
 0x7bc   : > { %1447 = vrot.lane.b32.xlu1 %v1445_v8, %s3300_s26  ;;  %v1699_v8 = vpack.i.b16 %v1690_v7, %v1690_v7 }
 0x7bd   : > { %v1556_v62 = vpop.f32.mrb[24].mxu1 }
 0x7be   : > { %v2669_v10 = vpop.f32.mrb[25].mxu1  ;;  %v1565_v13 = vmul.f32 %v2957_v11, %v1556_v62 }
 0x7bf   : > { %v1559_v12 = vpop.f32.mrb[26].mxu1 }
 0x7c0   : > { %v1566_v14 = vmul.f32 %v2955_v9, %v1559_v12  ;;  %v2670_v15 = vpop.f32.mrb[27].mxu1  ;;  %v1704_v12 = vrot.slane %v1699_v8, %v662_v32  ;;  %v2915_v32 = vld [vmem:[#allocation15 + $0x20] sm:$0xff]  }
 0x7c1   : > { %v2906_v15 = vld [vmem:[#allocation15 + $0x40] sm:$0xff]  }
 0x7c2   : > { %v1567_v16 = vpack.c.bf16 %v1566_v14, %v1565_v13  ;;  %2541 = vmatprep.subr.bf16.mxu1 %v2906_v15 }
 0x7c4   : > { %1569 = vrot.lane.b32.xlu1 %v1567_v16, %s3305_s24  ;;  %v2907_v16 = vld [vmem:[#allocation15] sm:$0xff]   ;;  %s4034_s24 = scalar_lea.sflag [#allocation5], %s627_s29 }
 0x826   : > { %v1316_v17 = vpop.permute.xlu1 %1315 }
 0x827   : > { %1319 = vst.msk [vmem:[#allocation2] sm:$0xff] %vm1318_vm6, %v1316_v17  ;;  %v2908_v17 = vld [vmem:[#allocation15 + $0x48] sm:$0xff]  }
 0x82e   : > { %v1448_v18 = vpop.permute.xlu1 %1447 }
 0x82f   : > { %1451 = vst.msk [vmem:[#allocation2] sm:$0xff] %vm1450_vm7, %v1448_v18  ;;  %v2909_v18 = vld [vmem:[#allocation15 + $0x8] sm:$0xff]  }
 0x836   : > { %v1570_v0 = vpop.permute.xlu1 %1569 }
 0x837   : > { %1573 = vst.msk [vmem:[#allocation2] sm:$0xff] %vm1572_vm8, %v1570_v0  ;;  %v2910_v0 = vld [vmem:[#allocation15 + $0x50] sm:$0xff]  }
 0x83e   : > { %v1574_v21 = vld [vmem:[#allocation2] sm:$0xff] }
 0x83f   : > { %2688 = vmatmul.mubr.bf16.vlgmr.msra.gmra.mrb[16].mxu0 %v1574_v21  ;;  %v2911_v21 = vld [vmem:[#allocation15 + $0x10] sm:$0xff]  }
 0x840   : > { %1942 = vmatpush1.bf16.msra.mxu0 %v2861_v24  ;;  %1973 = vmatprep.mubr.bf16.mxu0 %v3307_v56  ;;  %v2916_v24 = vld [vmem:[#allocation15 + $0x68] sm:$0xff]  }
 0x841   : > { %1943 = vmatprep.subr.bf16.mxu0 %v2869_v30  ;;  %v2919_v30 = vld [vmem:[#allocation15 + $0x30] sm:$0xff]  }
 0x844   : > { %1944 = vmatpush1.bf16.msra.mxu0 %v2867_v34  ;;  %v2921_v34 = vld [vmem:[#allocation15 + $0x38] sm:$0xff]  }
 0x845   : > { %1945 = vmatprep.subr.bf16.mxu0 %v2875_v36 }
 0x848   : > { %1946 = vmatpush1.bf16.msra.mxu0 %v2873_v38 }
 0x912   : > { %v1673_v39 = vpop.f32.mrb[16].mxu0 }
 0x913   : > { %v3980_v40 = vadd.f32 %v3680_v2, %v1673_v39  ;;  %v2689_v41 = vpop.f32.mrb[17].mxu0  ;;  %v2881_v2 = vld [vmem:[#allocation14 + $0x34] ss:$8 sps:$4 sm:$0xff]  }
 0x914   : > { %v1676_v42 = vpop.f32.mrb[18].mxu0  ;;  %1947 = vmatprep.subr.bf16.mxu0 %v2881_v2 }
 0x915   : > { %v3983_v19 = vadd.f32 %v3682_v3, %v1676_v42  ;;  %v2690_v43 = vpop.f32.mrb[19].mxu0  ;;  %v1682_v20 = vmul.f32 %v3980_v40, %v3980_v40  ;;  %v2879_v3 = vld [vmem:[#allocation14 + $0x30] ss:$8 sps:$4 sm:$0xff]  }
 0x916   : > { %1948 = vmatpush1.bf16.msra.mxu0 %v2879_v3 }
 0x917   : > { %1684 = vadd.xlane.f32.xlu0 %v1682_v20  ;;  %v1683_v44 = vmul.f32 %v3983_v19, %v3983_v19  ;;  %1949 = vmatprep.subr.bf16.mxu0 %v2887_v51 }
 0x919   : > { %1686 = vadd.xlane.f32.xlu1 %v1683_v44 }
 0x91a   : > { %1950 = vmatpush1.bf16.msra.mxu0 %v2885_v50 }
 0x91b   : > { %1951 = vmatprep.subr.bf16.mxu0 %v2893_v27 }
 0x91e   : > { %1952 = vmatpush1.bf16.msra.mxu0 %v2891_v54 }
 0x91f   : > { %1953 = vmatprep.subr.bf16.mxu0 %v2899_v48 }
 0x922   : > { %1954 = vmatpush1.bf16.msra.mxu0 %v2897_v58 }
 0x923   : > { %1955 = vmatprep.subr.bf16.mxu0 %v2905_v60 }
 0x926   : > { %1956 = vmatpush1.bf16.msra.mxu0 %v2903_v63 }
 0x9a4   : > { %v1685_v52 = vpop.xlane.xlu0 %1684 }
 0x9a5   : > { %v1688_v1 = vmul.f32 0.0078125, %v1685_v52 }
 0x9a6   : > { %v1687_v4 = vpop.xlane.xlu1 %1686 }
 0x9a7   : > { %v1691_v5 = vadd.f32 1e-05, %v1688_v1  ;;  %v1689_v28 = vmul.f32 0.0078125, %v1687_v4 }
 0x9a9   : > { %2958 = vrsqrt.f32 %v1691_v5  ;;  %v1692_v6 = vadd.f32 1e-05, %v1689_v28 }
 0x9ab   : > { %2960 = vrsqrt.f32 %v1692_v6 }
 0x9b3   : > { %v2959_v62 = vpop.eup %2958 }
 0x9b4   : > { %v1695_v10 = vmul.f32 %v2959_v62, %v3980_v40 }
 0x9b5   : > { %v2961_v9 = vpop.eup %2960 }
 0x9b6   : > { %v1696_v11 = vmul.f32 %v2961_v9, %v3983_v19 }
 0x9b8   : > { %v1697_v13 = vpack.c.bf16 %v1696_v11, %v1695_v10 }
 0x9ba   : > { %v1705_v14 = vmul.bf16 %v1704_v12, %v1697_v13 }
 0x9bc   : > { %1835 = vmatmul.mubr.bf16.vlgmr.msra.gmra.mrb[28].mxu1 %v1705_v14  ;;  %1974 = vmatmul.mubr.bf16.vlgmr.msra.gmra.mrb[20].mxu0 %v1705_v14 }
 0x9bd   : > { %2542 = vmatpush3.bf16.msra.mxu1 %v2907_v16 }
 0x9be   : > { %2543 = vmatprep.subr.bf16.mxu1 %v2908_v17 }
 0x9c1   : > { %2544 = vmatpush3.bf16.msra.mxu1 %v2909_v18 }
 0x9c2   : > { %2545 = vmatprep.subr.bf16.mxu1 %v2910_v0 }
 0x9c5   : > { %2546 = vmatpush3.bf16.msra.mxu1 %v2911_v21 }
 0x9c6   : > { %2547 = vmatprep.subr.bf16.mxu1 %v2912_v22 }
 0x9c9   : > { %2548 = vmatpush3.bf16.msra.mxu1 %v2913_v23 }
 0x9ca   : > { %2549 = vmatprep.subr.bf16.mxu1 %v2914_v29 }
 0x9cd   : > { %2550 = vmatpush3.bf16.msra.mxu1 %v2915_v32 }
 0x9ce   : > { %2551 = vmatprep.subr.bf16.mxu1 %v2916_v24 }
 0x9d1   : > { %2552 = vmatpush3.bf16.msra.mxu1 %v2917_v25 }
 0x9d2   : > { %2553 = vmatprep.subr.bf16.mxu1 %v2918_v26 }
 0x9d5   : > { %2554 = vmatpush3.bf16.msra.mxu1 %v2919_v30 }
 0x9d6   : > { %2555 = vmatprep.subr.bf16.mxu1 %v2920_v31 }
 0x9d9   : > { %2556 = vmatpush3.bf16.msra.mxu1 %v2921_v34 }
 0xa8f   : > { %v1836_v35 = vpop.f32.mrb[28].mxu1  ;;  %v1975_v36 = vpop.f32.mrb[20].mxu0 }
 0xa90   : > { %v2449_v37 = vmul.f32 -1.442695, %v1836_v35  ;;  %v1838_v38 = vpop.f32.mrb[29].mxu1  ;;  %v1977_v39 = vpop.f32.mrb[21].mxu0 }
 0xa91   : > { %v2450_v41 = vmul.f32 -1.442695, %v1838_v38  ;;  %v1840_v42 = vpop.f32.mrb[30].mxu1  ;;  %v1979_v43 = vpop.f32.mrb[22].mxu0 }
 0xa92   : > { %2962 = vpow2.f32 %v2449_v37  ;;  %v2451_v20 = vmul.f32 -1.442695, %v1840_v42  ;;  %v1842_v44 = vpop.f32.mrb[31].mxu1  ;;  %v1981_v45 = vpop.f32.mrb[23].mxu0 }
 0xa93   : > { %2964 = vpow2.f32 %v2450_v41  ;;  %v2452_v2 = vmul.f32 -1.442695, %v1842_v44 }
 0xa94   : > { %2966 = vpow2.f32 %v2451_v20 }
 0xa95   : > { %2968 = vpow2.f32 %v2452_v2 }
 0xa9c   : > { %v2963_v46 = vpop.eup %2962 }
 0xa9d   : > { %v2965_v3 = vpop.eup %2964  ;;  %v1996_v47 = vadd.f32 1.0, %v2963_v46 }
 0xa9e   : > { %v2967_v49 = vpop.eup %2966  ;;  %v1997_v50 = vadd.f32 1.0, %v2965_v3 }
 0xa9f   : > { %v2969_v51 = vpop.eup %2968  ;;  %2970 = vrcp.f32 %v1996_v47  ;;  %v1998_v53 = vadd.f32 1.0, %v2967_v49 }
 0xaa0   : > { %2972 = vrcp.f32 %v1997_v50  ;;  %v1999_v27 = vadd.f32 1.0, %v2969_v51 }
 0xaa1   : > { %2974 = vrcp.f32 %v1998_v53 }
 0xaa2   : > { %2976 = vrcp.f32 %v1999_v27 }
 0xaa9   : > { %v2971_v33 = vpop.eup %2970 }
 0xaaa   : > { %v2973_v54 = vpop.eup %2972  ;;  %v2008_v55 = vmul.f32 %v2971_v33, %v1836_v35 }
 0xaab   : > { %v2975_v48 = vpop.eup %2974  ;;  %v2009_v56 = vmul.f32 %v2973_v54, %v1838_v38 }
 0xaac   : > { %v2977_v57 = vpop.eup %2976  ;;  %v2012_v58 = vmul.f32 %v2008_v55, %v1975_v36  ;;  %v2010_v59 = vmul.f32 %v2975_v48, %v1840_v42 }
 0xaad   : > { %v2013_v60 = vmul.f32 %v2009_v56, %v1977_v39  ;;  %v2011_v61 = vmul.f32 %v2977_v57, %v1842_v44 }
 0xaae   : > { %v2014_v63 = vmul.f32 %v2010_v59, %v1979_v43 }
 0xaaf   : > { %v2015_v52 = vmul.f32 %v2011_v61, %v1981_v45 }
 0xab0   : > { %v2016_v1 = vpack.c.bf16 %v2014_v63, %v2012_v58 }
 0xab1   : > { %v2017_v4 = vpack.c.bf16 %v2015_v52, %v2013_v60 }
 0xab3   : > { %2178 = vmatprep.mubr.bf16.mxu1 %v2017_v4 }
 0xab4   : > { %2179 = vmatmul.mubr.bf16.vlgmr.msra.gmra.mrb[32].mxu1 %v2016_v1 }
 0xb87   : > { %v2557_v5 = vpop.f32.mrb[32].mxu1 }
 0xb88   : > { %v2558_v28 = vpop.f32.mrb[33].mxu1 }
 0xb89   : > { %v2559_v6 = vadd.f32 %v2558_v28, %v2557_v5  ;;  %v2560_v7 = vpop.f32.mrb[34].mxu1 }
 0xb8a   : > { %v2561_v8 = vpop.f32.mrb[35].mxu1 }
 0xb8b   : > { %v2562_v62 = vadd.f32 %v2561_v8, %v2560_v7  ;;  %v2187_v9 = vadd.f32 %v2559_v6, %v3980_v40 }
 0xb8d   : > { %v2188_v10 = vadd.f32 %v2562_v62, %v3983_v19 }
 0xb8f   : > { %v2487_v11 = vpack.c.bf16 %v2188_v10, %v2187_v9 }
 0xb91   : > { %2488 = vst [vmem:[%s629_s1] sm:$0xff] %v2487_v11  }
 0xb92   : > { %3215 = shalt.err (!%p3212_p4)
}
 0xb93   : > { %s3216_s27 = scalar_lea.hbm %s4030_s13, 128  ;;  %s3220_s20 = scalar_lea.hbm %s4149_s28, 256 }
 0xb94   : > { %p3217_p12 = scmp.ne.s32.totalorder %s4030_s13, %s3216_s27  ;;  %p3221_p11 = scmp.lt.u32.totalorder %s4030_s13, %s4149_s28 }
 0xb95   : > { %p3222_p13 = scmp.lt.u32.totalorder %s3220_s20, %s3216_s27  ;;  %p3224_p6 = scmp.lt.u32.totalorder %s3216_s27, %s4030_s13 }
 0xb96   : > { %p3218_p7 = pnand %p3217_p12, %p4150_p9 }
 0xb97   : > { %p3223_p1 = por %p3222_p13, %p3221_p11 }
 0xb98   : > { %p3219_p8 = pneg %p3218_p7 }
 0xb99   : > { %p3225_p5 = por %p3224_p6, %p3223_p1 }
 0xb9b   : > { %p3226_p0 = pnand %p3225_p5, %p3219_p8 }
 0xb9d   : > { %3229 = shalt.err (!%p3226_p0)
}
 0xb9e   : > { %s3309_s17 = smov 4  }
 0xb9f   : > { %2723 = dma.vmem_to_hbm [thread:$0]  (%p4150_p9), %s4032_s23, 128, %s4030_s13, %s4034_s24, %s3300_s26, %s3300_s26, %s3309_s17  }
 0xba0 PF: > { %s4151_s25 = sld [smem:[#allocation27_spill]]  ;;  %s4152_s3 = sld [smem:[#allocation24_spill]] }
 0xba1   : > { %s4153_s16 = sld [smem:[#allocation31_spill]] }
 0xba6   : > { %p2770_p10 = scmp.ge.s32.totalorder %s4151_s25, 2  ;;  %s2228_s18 = sand.u32 1, %s4152_s3  }
 0xba7   : > { %p4154_p2 = scmp.ne.s32.totalorder %s4153_s16, 0  ;;  %s2229_s27 = scalar_lea.sflag [#allocation5], %s2228_s18 }
 0xba9   : > { %p2751_p3 = pnand %p2770_p10, %p4154_p2 }
 0xbab   : > { %3267 = dma.done.wait (!%p2751_p3), %s2229_s27, 128  }
 0xbac   : > { %3269 = vsyncadd (!%p2751_p3), %s2229_s27, 4294967168  ;;  %s4155_s24 = sld [smem:[#allocation28_spill]]  ;;  %s4156_s21 = sld [smem:[#allocation25_spill]] }
 0xbad   : > { %s4157_s22 = sld [smem:[#allocation26_spill]]  ;;  %s4158_s23 = sld [smem:[#allocation29_spill]] }
 0xbb2   : > { %p31_p4 = scmp.ge.s32.totalorder %s4155_s24, 4  }
 0xbb4   :  { %33 = sbr.rel (!%p31_p4) target bundleno = 14 (0xe), region = 152 }
 0xbbb   :  { %2234 = vsyncpa [#allocation4], 1 }
 0xbbc   :  { %2236 = vsyncpa [#allocation4 + $0x1], 1 }
 0xbbd   :  { %2237 = vsyncpa [#allocation7], 1 }
 0xbbe   :  { %2238 = vsyncpa [#allocation10], 1 }
 0xbbf   :  { %2239 = vsyncpa [#allocation13], 1 }
 0xbc0   :  { %2240 = vsyncpa [#allocation16], 1 }
 0xbc1   :  { %2241 = vsyncpa [#allocation5], 1 }
 0xbc2   :  { %2243 = vsyncpa [#allocation5 + $0x1], 1 }

</bundles_post_ra>
